<compile_context>
chip_gen: v7x
topology: tpu7x:2x2x1
jax: 0.10.0
libtpu: 0.0.40
codegen_flags: <defaults>
</compile_context>

<pallas_src>
import functools

import jax
import jax.numpy as jnp
from jax import lax
from jax.experimental import pallas as pl
from jax.experimental.pallas import tpu as pltpu

_BN_EPS = 1e-3
MXU_DTYPE = jnp.bfloat16   # MXU operand dtype (accumulation stays f32)

OCP = 128                  # padded output-channel lane width
OC_B3 = 64                 # branch3x3 channels  (lanes [0, 64))
OC_B7 = 32                 # branch7x7 channels  (lanes [64, 96))
K1 = 7                     # fused stride-2 kernel size (7x7 hull)
K2 = 3                     # second conv kernel size
STRIDE1 = 2
NQ = (K1 + 1) // 2         # 4: packed stride-2 tap positions per spatial dim


def _fold_bn(w_pt, gamma, beta, mean, var, eps=_BN_EPS):
    """PyTorch (OC, IC, KH, KW) conv weight + BN(inference) -> HWIO weight, bias."""
    scale = gamma / jnp.sqrt(var + eps)
    bias = beta - mean * scale
    w_hwio = jnp.transpose(w_pt, (2, 3, 1, 0)) * scale[None, None, None, :]
    return w_hwio, bias


# ------------------------------ Pallas kernel ------------------------------ #
def _inception_z_kernel(xin_ref, w1_ref, b1_ref, w2_ref, b2_ref, out_ref, y1_ref):
    """Whole-module forward for one image.

    xin_ref: (Hq, Wq, 4*C)      bf16  phase-packed (space-to-depth) padded input
    w1_ref : (NQ*NQ, 4*C, 128)  bf16  fused + phase-packed stride-2 weights
    b1_ref : (1, 128)           f32   folded BN bias (b3_1 | b7 | 0)
    w2_ref : (9, 128, 128)      bf16  3x3 weights (real block [:, :64, :64])
    b2_ref : (1, 128)           f32
    out_ref: (OH, OW, 128)      f32   lanes 0:64 = b3_2, 64:96 = b7, 96:128 = 0
    y1_ref : (OH+2, OW+2, 128)  f32   zero-padded intermediate (VMEM scratch)
    """
    OH, OW, ocp = out_ref.shape
    M = OH * OW

    # ---- stage 1: fused stride-2 convs (branch3x3[0] ++ branch7x7) --------
    # Per-tap accumulation over the packed (qh, qw) taps; each tap is one
    # static window slice of the phase-packed input and a (M, 4C) x (4C, 128)
    # MXU dot with f32 accumulation.
    acc1 = jnp.zeros((M, ocp), jnp.float32)
    for q in range(NQ * NQ):
        qh, qw = q // NQ, q % NQ
        xs = xin_ref[qh:qh + OH, qw:qw + OW, :].reshape(M, -1)
        acc1 = acc1 + jnp.dot(xs, w1_ref[q], preferred_element_type=jnp.float32)
    y1 = jnp.maximum(acc1 + b1_ref[...], 0.0)               # (M, 128) f32

    # Zero-padded intermediate for the 3x3 pad=1 conv -- stays in VMEM, never
    # written back to HBM.  (Re-zero every step: scratch is per-core.)
    y1_ref[...] = jnp.zeros_like(y1_ref)
    y1_ref[1:1 + OH, 1:1 + OW, :] = y1.reshape(OH, OW, ocp)

    # ---- stage 2: 3x3/s1 conv on lanes [0:64); b7 (64:96) passes through --
    acc2 = jnp.zeros((M, ocp), jnp.float32)
    for t in range(K2 * K2):
        kh, kw = t // K2, t % K2
        ys = y1_ref[kh:kh + OH, kw:kw + OW, :].reshape(M, ocp).astype(MXU_DTYPE)
        acc2 = acc2 + jnp.dot(ys, w2_ref[t], preferred_element_type=jnp.float32)
    r2 = jnp.maximum(acc2 + b2_ref[...], 0.0)                # (M, 128) f32

    # Fused channel concat: lanes < 64 take the 3x3 result, lanes >= 64 keep
    # the stage-1 output (b7 channels; pad lanes are exactly 0).
    lane = lax.broadcasted_iota(jnp.int32, (M, ocp), 1)
    out = jnp.where(lane < OC_B3, r2, y1)
    out_ref[...] = out.reshape(OH, OW, ocp).astype(out_ref.dtype)


# -------------------------------- wrapper ---------------------------------- #
def _chip_aware_vmem_limit(requested_bytes):
    cap = 48 * 1024 * 1024                      # safe for v5e/v6e (128 MiB VMEM)
    try:                                        # v7x: only 64 MiB physical VMEM
        cap = min(cap, int(pltpu.get_tpu_info().vmem_capacity_bytes) // 2)
    except Exception:
        cap = 32 * 1024 * 1024                  # conservative fallback
    return int(min(max(requested_bytes, 8 * 1024 * 1024), cap))


def inception_z(x_nchw, params):
    """Forward of InceptionZ.  Input NCHW (PyTorch convention), output NCHW."""
    N, C, H, W = x_nchw.shape
    assert H % 2 == 0 and W % 2 == 0, "phase packing assumes even H, W"
    pad = K1 // 2                               # 3
    OH = (H + 2 * pad - K1) // STRIDE1 + 1
    OW = (W + 2 * pad - K1) // STRIDE1 + 1
    Hp, Wp = H + 2 * pad, W + 2 * pad
    Hq, Wq = Hp // 2, Wp // 2                   # phase-packed spatial extents

    # --- input: NHWC, pad, space-to-depth phase packing (a single 1x copy) --
    # xin[n, i, j, (a*2+b)*C + c] = xpad[n, 2*i + a, 2*j + b, c]
    x = jnp.transpose(x_nchw, (0, 2, 3, 1))
    xpad = jnp.pad(x, ((0, 0), (pad, pad), (pad, pad), (0, 0)))
    xin = (xpad.reshape(N, Hq, 2, Wq, 2, C)
               .transpose(0, 1, 3, 2, 4, 5)
               .reshape(N, Hq, Wq, 4 * C)
               .astype(MXU_DTYPE))

    # --- fused stride-2 weights: 3x3 embedded at the centre of a 7x7 hull ---
    w3, b3 = _fold_bn(*params["b3_1"])          # (3,3,C,64), (64,)
    w7, b7 = _fold_bn(*params["b7"])            # (7,7,C,32), (32,)
    c0 = (K1 - K2) // 2                         # centre offset = 2
    w1 = jnp.zeros((K1, K1, C, OCP), jnp.float32)
    w1 = w1.at[c0:c0 + K2, c0:c0 + K2, :, :OC_B3].set(w3)
    w1 = w1.at[:, :, :, OC_B3:OC_B3 + OC_B7].set(w7)
    b1 = jnp.zeros((1, OCP), jnp.float32)
    b1 = b1.at[0, :OC_B3].set(b3).at[0, OC_B3:OC_B3 + OC_B7].set(b7)
    # phase-pack taps: w1p[qh*NQ+qw, (a*2+b)*C+c, :] = w1[2qh+a, 2qw+b, c, :]
    w1p = jnp.zeros((2 * NQ, 2 * NQ, C, OCP), jnp.float32).at[:K1, :K1].set(w1)
    w1p = (w1p.reshape(NQ, 2, NQ, 2, C, OCP)
               .transpose(0, 2, 1, 3, 4, 5)
               .reshape(NQ * NQ, 4 * C, OCP)
               .astype(MXU_DTYPE))

    # --- second 3x3 conv, embedded in a lane-dense 128x128 tile -------------
    w3b, b3b = _fold_bn(*params["b3_2"])        # (3,3,64,64), (64,)
    w2 = jnp.zeros((K2, K2, OCP, OCP), jnp.float32)
    w2 = w2.at[:, :, :OC_B3, :OC_B3].set(w3b)
    w2p = w2.reshape(K2 * K2, OCP, OCP).astype(MXU_DTYPE)
    b2 = jnp.zeros((1, OCP), jnp.float32).at[0, :OC_B3].set(b3b)

    # --- one fused pallas_call over the batch --------------------------------
    xin_bytes = Hq * Wq * 4 * C * 2
    out_bytes = OH * OW * OCP * 4
    w_bytes = w1p.size * 2 + w2p.size * 2 + 2 * OCP * 4
    scratch_bytes = (OH + 2) * (OW + 2) * OCP * 4
    vmem_req = 2 * (xin_bytes + out_bytes) + w_bytes + scratch_bytes

    out = pl.pallas_call(
        _inception_z_kernel,
        out_shape=jax.ShapeDtypeStruct((N, OH, OW, OCP), jnp.float32),
        grid=(N,),
        in_specs=[
            pl.BlockSpec((None, Hq, Wq, 4 * C), lambda n: (n, 0, 0, 0)),
            pl.BlockSpec((NQ * NQ, 4 * C, OCP), lambda n: (0, 0, 0)),  # resident
            pl.BlockSpec((1, OCP), lambda n: (0, 0)),                  # resident
            pl.BlockSpec((K2 * K2, OCP, OCP), lambda n: (0, 0, 0)),    # resident
            pl.BlockSpec((1, OCP), lambda n: (0, 0)),                  # resident
        ],
        out_specs=pl.BlockSpec((None, OH, OW, OCP), lambda n: (n, 0, 0, 0)),
        scratch_shapes=[pltpu.VMEM((OH + 2, OW + 2, OCP), jnp.float32)],
        compiler_params=pltpu.CompilerParams(
            dimension_semantics=("parallel",),
            vmem_limit_bytes=_chip_aware_vmem_limit(4 * vmem_req),
        ),
    )(xin, w1p, b1, w2p, b2)

    out = out[..., :OC_B3 + OC_B7]              # (N, OH, OW, 96)
    return jnp.transpose(out, (0, 3, 1, 2))     # -> NCHW


# ---------------------------- parameter creation ---------------------------- #
def init_basic_conv(key, in_ch, out_ch, k):
    kw_, kg, kb, km, kv = jax.random.split(key, 5)
    w = 0.1 * jax.random.normal(kw_, (out_ch, in_ch, k, k), jnp.float32)
    gamma = 1.0 + 0.1 * jax.random.normal(kg, (out_ch,), jnp.float32)
    beta = 0.1 * jax.random.normal(kb, (out_ch,), jnp.float32)
    mean = 0.1 * jax.random.normal(km, (out_ch,), jnp.float32)
    var = jnp.abs(jax.random.normal(kv, (out_ch,), jnp.float32)) + 0.5
    return (w, gamma, beta, mean, var)


def init_inception_z(key, in_channels):
    k1, k2, k3 = jax.random.split(key, 3)
    return {
        "b3_1": init_basic_conv(k1, in_channels, OC_B3, 3),
        "b3_2": init_basic_conv(k2, OC_B3, OC_B3, 3),
        "b7": init_basic_conv(k3, in_channels, OC_B7, 7),
    }


# ------------------------------ pure-JAX refs ------------------------------- #
def _ref_basic_conv2d(x_nhwc, params, stride, pad, eps=_BN_EPS,
                      match_mxu_dtype=False):
    w, gamma, beta, mean, var = params
    scale = gamma / jnp.sqrt(var + eps)
    bias = beta - mean * scale
    w_hwio = jnp.transpose(w, (2, 3, 1, 0)) * scale            # BN scale folded
    x_in = x_nhwc
    if match_mxu_dtype:                    # mirror the kernel's bf16 operands
        w_hwio = w_hwio.astype(MXU_DTYPE)
        x_in = x_nhwc.astype(MXU_DTYPE)
    y = lax.conv_general_dilated(
        x_in, w_hwio, (stride, stride), [(pad, pad), (pad, pad)],
        dimension_numbers=("NHWC", "HWIO", "NHWC"),
        preferred_element_type=jnp.float32,
    )
    return jnp.maximum(y + bias, 0.0)


def _ref_inception_z(x_nchw, params, match_mxu_dtype=False):
    x = jnp.transpose(x_nchw, (0, 2, 3, 1))
    b3 = _ref_basic_conv2d(x, params["b3_1"], 2, 1,
                           match_mxu_dtype=match_mxu_dtype)
    b3 = _ref_basic_conv2d(b3, params["b3_2"], 1, 1,
                           match_mxu_dtype=match_mxu_dtype)
    b7 = _ref_basic_conv2d(x, params["b7"], 2, 3,
                           match_mxu_dtype=match_mxu_dtype)
    out = jnp.concatenate([b3, b7], axis=-1)
    return jnp.transpose(out, (0, 3, 1, 2))


# ----------------------------------- main ----------------------------------- #
if __name__ == "__main__":
    key = jax.random.PRNGKey(0)
    kx, kp = jax.random.split(key)

    N, C, H, W = 2, 4, 16, 16
    x = jax.random.normal(kx, (N, C, H, W), jnp.float32)
    params = init_inception_z(kp, C)

    fwd = jax.jit(functools.partial(inception_z, params=params))
    out = jax.block_until_ready(fwd(x))
    assert out.shape == (N, 96, H // 2, W // 2), out.shape

    # Tight check vs a reference that mirrors the kernel's bf16-operand /
    # f32-accumulate math (only summation order differs).
    ref_match = jax.block_until_ready(
        _ref_inception_z(x, params, match_mxu_dtype=True))
    err_m = float(jnp.max(jnp.abs(out - ref_match)))
    assert jnp.allclose(out, ref_match, atol=1e-2, rtol=1e-2), err_m

    # Loose check vs the full-f32 reference (bf16 MXU operands => ~1e-2 err).
    ref_f32 = jax.block_until_ready(_ref_inception_z(x, params))
    err_f = float(jnp.max(jnp.abs(out - ref_f32)))
    assert jnp.allclose(out, ref_f32, atol=1e-1, rtol=1e-1), err_f

    print("KERNEL_OK")
</pallas_src>

<mosaic_0001>
module attributes {stable_mosaic.version = 11 : i64} {
  func.func @_inception_z_kernel(%arg0: i32, %arg1: memref<1x11x11x16xbf16, #tpu.memory_space<vmem>>, %arg2: memref<16x16x128xbf16, #tpu.memory_space<vmem>>, %arg3: memref<1x128xf32, #tpu.memory_space<vmem>>, %arg4: memref<9x128x128xbf16, #tpu.memory_space<vmem>>, %arg5: memref<1x128xf32, #tpu.memory_space<vmem>>, %arg6: memref<1x8x8x128xf32, #tpu.memory_space<vmem>>, %arg7: memref<10x10x128xf32, #tpu.memory_space<vmem>>) attributes {dimension_semantics = [#tpu.dimension_semantics<parallel>], iteration_bounds = array<i64: 2>, scalar_prefetch = 0 : i64, scratch_operands = 1 : i64, tpu.core_type = #tpu.core_type<tc>, window_params = [{transform_indices = @transform_0, window_bounds = array<i64: 1, 11, 11, 16>}, {pipeline_mode = #tpu.pipeline_mode<synchronous>, transform_indices = @transform_1, window_bounds = array<i64: 16, 16, 128>}, {pipeline_mode = #tpu.pipeline_mode<synchronous>, transform_indices = @transform_2, window_bounds = array<i64: 1, 128>}, {pipeline_mode = #tpu.pipeline_mode<synchronous>, transform_indices = @transform_3, window_bounds = array<i64: 9, 128, 128>}, {pipeline_mode = #tpu.pipeline_mode<synchronous>, transform_indices = @transform_4, window_bounds = array<i64: 1, 128>}, {transform_indices = @transform_5, window_bounds = array<i64: 1, 8, 8, 128>}]} {
    %cst = arith.constant 0.000000e+00 : f32
    %0 = vector.broadcast %cst : f32 to vector<64x128xf32>
    %c0 = arith.constant 0 : index
    %c0_0 = arith.constant 0 : index
    %c0_1 = arith.constant 0 : index
    %c0_2 = arith.constant 0 : index
    %1 = vector.load %arg1[%c0, %c0_0, %c0_1, %c0_2] : memref<1x11x11x16xbf16, #tpu.memory_space<vmem>>, vector<1x8x8x16xbf16>
    %2 = vector.shape_cast %1 : vector<1x8x8x16xbf16> to vector<8x8x16xbf16>
    %3 = vector.shape_cast %2 : vector<8x8x16xbf16> to vector<64x16xbf16>
    %c0_3 = arith.constant 0 : index
    %c0_4 = arith.constant 0 : index
    %c0_5 = arith.constant 0 : index
    %4 = vector.load %arg2[%c0_3, %c0_4, %c0_5] : memref<16x16x128xbf16, #tpu.memory_space<vmem>>, vector<1x16x128xbf16>
    %5 = vector.shape_cast %4 : vector<1x16x128xbf16> to vector<16x128xbf16>
    %cst_6 = arith.constant dense<0.000000e+00> : vector<64x128xf32>
    %6 = tpu.matmul %3, %5, %cst_6 {dimension_numbers = #tpu.dot_dimension_numbers<[1], [0], [0], [1], [0, 0, 1, 1], [], []>} : vector<64x16xbf16>, vector<16x128xbf16>, vector<64x128xf32> -> vector<64x128xf32>
    %7 = arith.addf %0, %6 : vector<64x128xf32>
    %c0_7 = arith.constant 0 : index
    %c0_8 = arith.constant 0 : index
    %c1 = arith.constant 1 : index
    %c0_9 = arith.constant 0 : index
    %8 = vector.load %arg1[%c0_7, %c0_8, %c1, %c0_9] : memref<1x11x11x16xbf16, #tpu.memory_space<vmem>>, vector<1x8x8x16xbf16>
    %9 = vector.shape_cast %8 : vector<1x8x8x16xbf16> to vector<8x8x16xbf16>
    %10 = vector.shape_cast %9 : vector<8x8x16xbf16> to vector<64x16xbf16>
    %c1_10 = arith.constant 1 : index
    %c0_11 = arith.constant 0 : index
    %c0_12 = arith.constant 0 : index
    %11 = vector.load %arg2[%c1_10, %c0_11, %c0_12] : memref<16x16x128xbf16, #tpu.memory_space<vmem>>, vector<1x16x128xbf16>
    %12 = vector.shape_cast %11 : vector<1x16x128xbf16> to vector<16x128xbf16>
    %cst_13 = arith.constant dense<0.000000e+00> : vector<64x128xf32>
    %13 = tpu.matmul %10, %12, %cst_13 {dimension_numbers = #tpu.dot_dimension_numbers<[1], [0], [0], [1], [0, 0, 1, 1], [], []>} : vector<64x16xbf16>, vector<16x128xbf16>, vector<64x128xf32> -> vector<64x128xf32>
    %14 = arith.addf %7, %13 : vector<64x128xf32>
    %c0_14 = arith.constant 0 : index
    %c0_15 = arith.constant 0 : index
    %c2 = arith.constant 2 : index
    %c0_16 = arith.constant 0 : index
    %15 = vector.load %arg1[%c0_14, %c0_15, %c2, %c0_16] : memref<1x11x11x16xbf16, #tpu.memory_space<vmem>>, vector<1x8x8x16xbf16>
    %16 = vector.shape_cast %15 : vector<1x8x8x16xbf16> to vector<8x8x16xbf16>
    %17 = vector.shape_cast %16 : vector<8x8x16xbf16> to vector<64x16xbf16>
    %c2_17 = arith.constant 2 : index
    %c0_18 = arith.constant 0 : index
    %c0_19 = arith.constant 0 : index
    %18 = vector.load %arg2[%c2_17, %c0_18, %c0_19] : memref<16x16x128xbf16, #tpu.memory_space<vmem>>, vector<1x16x128xbf16>
    %19 = vector.shape_cast %18 : vector<1x16x128xbf16> to vector<16x128xbf16>
    %cst_20 = arith.constant dense<0.000000e+00> : vector<64x128xf32>
    %20 = tpu.matmul %17, %19, %cst_20 {dimension_numbers = #tpu.dot_dimension_numbers<[1], [0], [0], [1], [0, 0, 1, 1], [], []>} : vector<64x16xbf16>, vector<16x128xbf16>, vector<64x128xf32> -> vector<64x128xf32>
    %21 = arith.addf %14, %20 : vector<64x128xf32>
    %c0_21 = arith.constant 0 : index
    %c0_22 = arith.constant 0 : index
    %c3 = arith.constant 3 : index
    %c0_23 = arith.constant 0 : index
    %22 = vector.load %arg1[%c0_21, %c0_22, %c3, %c0_23] : memref<1x11x11x16xbf16, #tpu.memory_space<vmem>>, vector<1x8x8x16xbf16>
    %23 = vector.shape_cast %22 : vector<1x8x8x16xbf16> to vector<8x8x16xbf16>
    %24 = vector.shape_cast %23 : vector<8x8x16xbf16> to vector<64x16xbf16>
    %c3_24 = arith.constant 3 : index
    %c0_25 = arith.constant 0 : index
    %c0_26 = arith.constant 0 : index
    %25 = vector.load %arg2[%c3_24, %c0_25, %c0_26] : memref<16x16x128xbf16, #tpu.memory_space<vmem>>, vector<1x16x128xbf16>
    %26 = vector.shape_cast %25 : vector<1x16x128xbf16> to vector<16x128xbf16>
    %cst_27 = arith.constant dense<0.000000e+00> : vector<64x128xf32>
    %27 = tpu.matmul %24, %26, %cst_27 {dimension_numbers = #tpu.dot_dimension_numbers<[1], [0], [0], [1], [0, 0, 1, 1], [], []>} : vector<64x16xbf16>, vector<16x128xbf16>, vector<64x128xf32> -> vector<64x128xf32>
    %28 = arith.addf %21, %27 : vector<64x128xf32>
    %c0_28 = arith.constant 0 : index
    %c1_29 = arith.constant 1 : index
    %c0_30 = arith.constant 0 : index
    %c0_31 = arith.constant 0 : index
    %29 = vector.load %arg1[%c0_28, %c1_29, %c0_30, %c0_31] : memref<1x11x11x16xbf16, #tpu.memory_space<vmem>>, vector<1x8x8x16xbf16>
    %30 = vector.shape_cast %29 : vector<1x8x8x16xbf16> to vector<8x8x16xbf16>
    %31 = vector.shape_cast %30 : vector<8x8x16xbf16> to vector<64x16xbf16>
    %c4 = arith.constant 4 : index
    %c0_32 = arith.constant 0 : index
    %c0_33 = arith.constant 0 : index
    %32 = vector.load %arg2[%c4, %c0_32, %c0_33] : memref<16x16x128xbf16, #tpu.memory_space<vmem>>, vector<1x16x128xbf16>
    %33 = vector.shape_cast %32 : vector<1x16x128xbf16> to vector<16x128xbf16>
    %cst_34 = arith.constant dense<0.000000e+00> : vector<64x128xf32>
    %34 = tpu.matmul %31, %33, %cst_34 {dimension_numbers = #tpu.dot_dimension_numbers<[1], [0], [0], [1], [0, 0, 1, 1], [], []>} : vector<64x16xbf16>, vector<16x128xbf16>, vector<64x128xf32> -> vector<64x128xf32>
    %35 = arith.addf %28, %34 : vector<64x128xf32>
    %c0_35 = arith.constant 0 : index
    %c1_36 = arith.constant 1 : index
    %c1_37 = arith.constant 1 : index
    %c0_38 = arith.constant 0 : index
    %36 = vector.load %arg1[%c0_35, %c1_36, %c1_37, %c0_38] : memref<1x11x11x16xbf16, #tpu.memory_space<vmem>>, vector<1x8x8x16xbf16>
    %37 = vector.shape_cast %36 : vector<1x8x8x16xbf16> to vector<8x8x16xbf16>
    %38 = vector.shape_cast %37 : vector<8x8x16xbf16> to vector<64x16xbf16>
    %c5 = arith.constant 5 : index
    %c0_39 = arith.constant 0 : index
    %c0_40 = arith.constant 0 : index
    %39 = vector.load %arg2[%c5, %c0_39, %c0_40] : memref<16x16x128xbf16, #tpu.memory_space<vmem>>, vector<1x16x128xbf16>
    %40 = vector.shape_cast %39 : vector<1x16x128xbf16> to vector<16x128xbf16>
    %cst_41 = arith.constant dense<0.000000e+00> : vector<64x128xf32>
    %41 = tpu.matmul %38, %40, %cst_41 {dimension_numbers = #tpu.dot_dimension_numbers<[1], [0], [0], [1], [0, 0, 1, 1], [], []>} : vector<64x16xbf16>, vector<16x128xbf16>, vector<64x128xf32> -> vector<64x128xf32>
    %42 = arith.addf %35, %41 : vector<64x128xf32>
    %c0_42 = arith.constant 0 : index
    %c1_43 = arith.constant 1 : index
    %c2_44 = arith.constant 2 : index
    %c0_45 = arith.constant 0 : index
    %43 = vector.load %arg1[%c0_42, %c1_43, %c2_44, %c0_45] : memref<1x11x11x16xbf16, #tpu.memory_space<vmem>>, vector<1x8x8x16xbf16>
    %44 = vector.shape_cast %43 : vector<1x8x8x16xbf16> to vector<8x8x16xbf16>
    %45 = vector.shape_cast %44 : vector<8x8x16xbf16> to vector<64x16xbf16>
    %c6 = arith.constant 6 : index
    %c0_46 = arith.constant 0 : index
    %c0_47 = arith.constant 0 : index
    %46 = vector.load %arg2[%c6, %c0_46, %c0_47] : memref<16x16x128xbf16, #tpu.memory_space<vmem>>, vector<1x16x128xbf16>
    %47 = vector.shape_cast %46 : vector<1x16x128xbf16> to vector<16x128xbf16>
    %cst_48 = arith.constant dense<0.000000e+00> : vector<64x128xf32>
    %48 = tpu.matmul %45, %47, %cst_48 {dimension_numbers = #tpu.dot_dimension_numbers<[1], [0], [0], [1], [0, 0, 1, 1], [], []>} : vector<64x16xbf16>, vector<16x128xbf16>, vector<64x128xf32> -> vector<64x128xf32>
    %49 = arith.addf %42, %48 : vector<64x128xf32>
    %c0_49 = arith.constant 0 : index
    %c1_50 = arith.constant 1 : index
    %c3_51 = arith.constant 3 : index
    %c0_52 = arith.constant 0 : index
    %50 = vector.load %arg1[%c0_49, %c1_50, %c3_51, %c0_52] : memref<1x11x11x16xbf16, #tpu.memory_space<vmem>>, vector<1x8x8x16xbf16>
    %51 = vector.shape_cast %50 : vector<1x8x8x16xbf16> to vector<8x8x16xbf16>
    %52 = vector.shape_cast %51 : vector<8x8x16xbf16> to vector<64x16xbf16>
    %c7 = arith.constant 7 : index
    %c0_53 = arith.constant 0 : index
    %c0_54 = arith.constant 0 : index
    %53 = vector.load %arg2[%c7, %c0_53, %c0_54] : memref<16x16x128xbf16, #tpu.memory_space<vmem>>, vector<1x16x128xbf16>
    %54 = vector.shape_cast %53 : vector<1x16x128xbf16> to vector<16x128xbf16>
    %cst_55 = arith.constant dense<0.000000e+00> : vector<64x128xf32>
    %55 = tpu.matmul %52, %54, %cst_55 {dimension_numbers = #tpu.dot_dimension_numbers<[1], [0], [0], [1], [0, 0, 1, 1], [], []>} : vector<64x16xbf16>, vector<16x128xbf16>, vector<64x128xf32> -> vector<64x128xf32>
    %56 = arith.addf %49, %55 : vector<64x128xf32>
    %c0_56 = arith.constant 0 : index
    %c2_57 = arith.constant 2 : index
    %c0_58 = arith.constant 0 : index
    %c0_59 = arith.constant 0 : index
    %57 = vector.load %arg1[%c0_56, %c2_57, %c0_58, %c0_59] : memref<1x11x11x16xbf16, #tpu.memory_space<vmem>>, vector<1x8x8x16xbf16>
    %58 = vector.shape_cast %57 : vector<1x8x8x16xbf16> to vector<8x8x16xbf16>
    %59 = vector.shape_cast %58 : vector<8x8x16xbf16> to vector<64x16xbf16>
    %c8 = arith.constant 8 : index
    %c0_60 = arith.constant 0 : index
    %c0_61 = arith.constant 0 : index
    %60 = vector.load %arg2[%c8, %c0_60, %c0_61] : memref<16x16x128xbf16, #tpu.memory_space<vmem>>, vector<1x16x128xbf16>
    %61 = vector.shape_cast %60 : vector<1x16x128xbf16> to vector<16x128xbf16>
    %cst_62 = arith.constant dense<0.000000e+00> : vector<64x128xf32>
    %62 = tpu.matmul %59, %61, %cst_62 {dimension_numbers = #tpu.dot_dimension_numbers<[1], [0], [0], [1], [0, 0, 1, 1], [], []>} : vector<64x16xbf16>, vector<16x128xbf16>, vector<64x128xf32> -> vector<64x128xf32>
    %63 = arith.addf %56, %62 : vector<64x128xf32>
    %c0_63 = arith.constant 0 : index
    %c2_64 = arith.constant 2 : index
    %c1_65 = arith.constant 1 : index
    %c0_66 = arith.constant 0 : index
    %64 = vector.load %arg1[%c0_63, %c2_64, %c1_65, %c0_66] : memref<1x11x11x16xbf16, #tpu.memory_space<vmem>>, vector<1x8x8x16xbf16>
    %65 = vector.shape_cast %64 : vector<1x8x8x16xbf16> to vector<8x8x16xbf16>
    %66 = vector.shape_cast %65 : vector<8x8x16xbf16> to vector<64x16xbf16>
    %c9 = arith.constant 9 : index
    %c0_67 = arith.constant 0 : index
    %c0_68 = arith.constant 0 : index
    %67 = vector.load %arg2[%c9, %c0_67, %c0_68] : memref<16x16x128xbf16, #tpu.memory_space<vmem>>, vector<1x16x128xbf16>
    %68 = vector.shape_cast %67 : vector<1x16x128xbf16> to vector<16x128xbf16>
    %cst_69 = arith.constant dense<0.000000e+00> : vector<64x128xf32>
    %69 = tpu.matmul %66, %68, %cst_69 {dimension_numbers = #tpu.dot_dimension_numbers<[1], [0], [0], [1], [0, 0, 1, 1], [], []>} : vector<64x16xbf16>, vector<16x128xbf16>, vector<64x128xf32> -> vector<64x128xf32>
    %70 = arith.addf %63, %69 : vector<64x128xf32>
    %c0_70 = arith.constant 0 : index
    %c2_71 = arith.constant 2 : index
    %c2_72 = arith.constant 2 : index
    %c0_73 = arith.constant 0 : index
    %71 = vector.load %arg1[%c0_70, %c2_71, %c2_72, %c0_73] : memref<1x11x11x16xbf16, #tpu.memory_space<vmem>>, vector<1x8x8x16xbf16>
    %72 = vector.shape_cast %71 : vector<1x8x8x16xbf16> to vector<8x8x16xbf16>
    %73 = vector.shape_cast %72 : vector<8x8x16xbf16> to vector<64x16xbf16>
    %c10 = arith.constant 10 : index
    %c0_74 = arith.constant 0 : index
    %c0_75 = arith.constant 0 : index
    %74 = vector.load %arg2[%c10, %c0_74, %c0_75] : memref<16x16x128xbf16, #tpu.memory_space<vmem>>, vector<1x16x128xbf16>
    %75 = vector.shape_cast %74 : vector<1x16x128xbf16> to vector<16x128xbf16>
    %cst_76 = arith.constant dense<0.000000e+00> : vector<64x128xf32>
    %76 = tpu.matmul %73, %75, %cst_76 {dimension_numbers = #tpu.dot_dimension_numbers<[1], [0], [0], [1], [0, 0, 1, 1], [], []>} : vector<64x16xbf16>, vector<16x128xbf16>, vector<64x128xf32> -> vector<64x128xf32>
    %77 = arith.addf %70, %76 : vector<64x128xf32>
    %c0_77 = arith.constant 0 : index
    %c2_78 = arith.constant 2 : index
    %c3_79 = arith.constant 3 : index
    %c0_80 = arith.constant 0 : index
    %78 = vector.load %arg1[%c0_77, %c2_78, %c3_79, %c0_80] : memref<1x11x11x16xbf16, #tpu.memory_space<vmem>>, vector<1x8x8x16xbf16>
    %79 = vector.shape_cast %78 : vector<1x8x8x16xbf16> to vector<8x8x16xbf16>
    %80 = vector.shape_cast %79 : vector<8x8x16xbf16> to vector<64x16xbf16>
    %c11 = arith.constant 11 : index
    %c0_81 = arith.constant 0 : index
    %c0_82 = arith.constant 0 : index
    %81 = vector.load %arg2[%c11, %c0_81, %c0_82] : memref<16x16x128xbf16, #tpu.memory_space<vmem>>, vector<1x16x128xbf16>
    %82 = vector.shape_cast %81 : vector<1x16x128xbf16> to vector<16x128xbf16>
    %cst_83 = arith.constant dense<0.000000e+00> : vector<64x128xf32>
    %83 = tpu.matmul %80, %82, %cst_83 {dimension_numbers = #tpu.dot_dimension_numbers<[1], [0], [0], [1], [0, 0, 1, 1], [], []>} : vector<64x16xbf16>, vector<16x128xbf16>, vector<64x128xf32> -> vector<64x128xf32>
    %84 = arith.addf %77, %83 : vector<64x128xf32>
    %c0_84 = arith.constant 0 : index
    %c3_85 = arith.constant 3 : index
    %c0_86 = arith.constant 0 : index
    %c0_87 = arith.constant 0 : index
    %85 = vector.load %arg1[%c0_84, %c3_85, %c0_86, %c0_87] : memref<1x11x11x16xbf16, #tpu.memory_space<vmem>>, vector<1x8x8x16xbf16>
    %86 = vector.shape_cast %85 : vector<1x8x8x16xbf16> to vector<8x8x16xbf16>
    %87 = vector.shape_cast %86 : vector<8x8x16xbf16> to vector<64x16xbf16>
    %c12 = arith.constant 12 : index
    %c0_88 = arith.constant 0 : index
    %c0_89 = arith.constant 0 : index
    %88 = vector.load %arg2[%c12, %c0_88, %c0_89] : memref<16x16x128xbf16, #tpu.memory_space<vmem>>, vector<1x16x128xbf16>
    %89 = vector.shape_cast %88 : vector<1x16x128xbf16> to vector<16x128xbf16>
    %cst_90 = arith.constant dense<0.000000e+00> : vector<64x128xf32>
    %90 = tpu.matmul %87, %89, %cst_90 {dimension_numbers = #tpu.dot_dimension_numbers<[1], [0], [0], [1], [0, 0, 1, 1], [], []>} : vector<64x16xbf16>, vector<16x128xbf16>, vector<64x128xf32> -> vector<64x128xf32>
    %91 = arith.addf %84, %90 : vector<64x128xf32>
    %c0_91 = arith.constant 0 : index
    %c3_92 = arith.constant 3 : index
    %c1_93 = arith.constant 1 : index
    %c0_94 = arith.constant 0 : index
    %92 = vector.load %arg1[%c0_91, %c3_92, %c1_93, %c0_94] : memref<1x11x11x16xbf16, #tpu.memory_space<vmem>>, vector<1x8x8x16xbf16>
    %93 = vector.shape_cast %92 : vector<1x8x8x16xbf16> to vector<8x8x16xbf16>
    %94 = vector.shape_cast %93 : vector<8x8x16xbf16> to vector<64x16xbf16>
    %c13 = arith.constant 13 : index
    %c0_95 = arith.constant 0 : index
    %c0_96 = arith.constant 0 : index
    %95 = vector.load %arg2[%c13, %c0_95, %c0_96] : memref<16x16x128xbf16, #tpu.memory_space<vmem>>, vector<1x16x128xbf16>
    %96 = vector.shape_cast %95 : vector<1x16x128xbf16> to vector<16x128xbf16>
    %cst_97 = arith.constant dense<0.000000e+00> : vector<64x128xf32>
    %97 = tpu.matmul %94, %96, %cst_97 {dimension_numbers = #tpu.dot_dimension_numbers<[1], [0], [0], [1], [0, 0, 1, 1], [], []>} : vector<64x16xbf16>, vector<16x128xbf16>, vector<64x128xf32> -> vector<64x128xf32>
    %98 = arith.addf %91, %97 : vector<64x128xf32>
    %c0_98 = arith.constant 0 : index
    %c3_99 = arith.constant 3 : index
    %c2_100 = arith.constant 2 : index
    %c0_101 = arith.constant 0 : index
    %99 = vector.load %arg1[%c0_98, %c3_99, %c2_100, %c0_101] : memref<1x11x11x16xbf16, #tpu.memory_space<vmem>>, vector<1x8x8x16xbf16>
    %100 = vector.shape_cast %99 : vector<1x8x8x16xbf16> to vector<8x8x16xbf16>
    %101 = vector.shape_cast %100 : vector<8x8x16xbf16> to vector<64x16xbf16>
    %c14 = arith.constant 14 : index
    %c0_102 = arith.constant 0 : index
    %c0_103 = arith.constant 0 : index
    %102 = vector.load %arg2[%c14, %c0_102, %c0_103] : memref<16x16x128xbf16, #tpu.memory_space<vmem>>, vector<1x16x128xbf16>
    %103 = vector.shape_cast %102 : vector<1x16x128xbf16> to vector<16x128xbf16>
    %cst_104 = arith.constant dense<0.000000e+00> : vector<64x128xf32>
    %104 = tpu.matmul %101, %103, %cst_104 {dimension_numbers = #tpu.dot_dimension_numbers<[1], [0], [0], [1], [0, 0, 1, 1], [], []>} : vector<64x16xbf16>, vector<16x128xbf16>, vector<64x128xf32> -> vector<64x128xf32>
    %105 = arith.addf %98, %104 : vector<64x128xf32>
    %c0_105 = arith.constant 0 : index
    %c3_106 = arith.constant 3 : index
    %c3_107 = arith.constant 3 : index
    %c0_108 = arith.constant 0 : index
    %106 = vector.load %arg1[%c0_105, %c3_106, %c3_107, %c0_108] : memref<1x11x11x16xbf16, #tpu.memory_space<vmem>>, vector<1x8x8x16xbf16>
    %107 = vector.shape_cast %106 : vector<1x8x8x16xbf16> to vector<8x8x16xbf16>
    %108 = vector.shape_cast %107 : vector<8x8x16xbf16> to vector<64x16xbf16>
    %c15 = arith.constant 15 : index
    %c0_109 = arith.constant 0 : index
    %c0_110 = arith.constant 0 : index
    %109 = vector.load %arg2[%c15, %c0_109, %c0_110] : memref<16x16x128xbf16, #tpu.memory_space<vmem>>, vector<1x16x128xbf16>
    %110 = vector.shape_cast %109 : vector<1x16x128xbf16> to vector<16x128xbf16>
    %cst_111 = arith.constant dense<0.000000e+00> : vector<64x128xf32>
    %111 = tpu.matmul %108, %110, %cst_111 {dimension_numbers = #tpu.dot_dimension_numbers<[1], [0], [0], [1], [0, 0, 1, 1], [], []>} : vector<64x16xbf16>, vector<16x128xbf16>, vector<64x128xf32> -> vector<64x128xf32>
    %112 = arith.addf %105, %111 : vector<64x128xf32>
    %c0_112 = arith.constant 0 : index
    %c0_113 = arith.constant 0 : index
    %113 = vector.load %arg3[%c0_112, %c0_113] : memref<1x128xf32, #tpu.memory_space<vmem>>, vector<1x128xf32>
    %114 = vector.broadcast %113 : vector<1x128xf32> to vector<64x128xf32>
    %115 = arith.addf %112, %114 : vector<64x128xf32>
    %cst_114 = arith.constant 0.000000e+00 : f32
    %116 = vector.broadcast %cst_114 : f32 to vector<64x128xf32>
    %117 = arith.maximumf %115, %116 : vector<64x128xf32>
    %cst_115 = arith.constant 0.000000e+00 : f32
    %118 = vector.broadcast %cst_115 : f32 to vector<10x10x128xf32>
    %c0_116 = arith.constant 0 : index
    %c0_117 = arith.constant 0 : index
    %c0_118 = arith.constant 0 : index
    %119 = vector.load %arg7[%c0_116, %c0_117, %c0_118] : memref<10x10x128xf32, #tpu.memory_space<vmem>>, vector<10x10x128xf32>
    tpu.vector_store %arg7[%c0_116, %c0_117, %c0_118], %118 {strides = array<i32>} : memref<10x10x128xf32, #tpu.memory_space<vmem>>, vector<10x10x128xf32>,
    %120 = vector.shape_cast %117 : vector<64x128xf32> to vector<8x8x128xf32>
    %c1_119 = arith.constant 1 : index
    %c1_120 = arith.constant 1 : index
    %c0_121 = arith.constant 0 : index
    %121 = vector.load %arg7[%c1_119, %c1_120, %c0_121] : memref<10x10x128xf32, #tpu.memory_space<vmem>>, vector<8x8x128xf32>
    tpu.vector_store %arg7[%c1_119, %c1_120, %c0_121], %120 {strides = array<i32>} : memref<10x10x128xf32, #tpu.memory_space<vmem>>, vector<8x8x128xf32>,
    %cst_122 = arith.constant 0.000000e+00 : f32
    %122 = vector.broadcast %cst_122 : f32 to vector<64x128xf32>
    %c0_123 = arith.constant 0 : index
    %c0_124 = arith.constant 0 : index
    %c0_125 = arith.constant 0 : index
    %123 = vector.load %arg7[%c0_123, %c0_124, %c0_125] : memref<10x10x128xf32, #tpu.memory_space<vmem>>, vector<8x8x128xf32>
    %124 = vector.shape_cast %123 : vector<8x8x128xf32> to vector<64x128xf32>
    %125 = arith.truncf %124 : vector<64x128xf32> to vector<64x128xbf16>
    %c0_126 = arith.constant 0 : index
    %c0_127 = arith.constant 0 : index
    %c0_128 = arith.constant 0 : index
    %126 = vector.load %arg4[%c0_126, %c0_127, %c0_128] : memref<9x128x128xbf16, #tpu.memory_space<vmem>>, vector<1x128x128xbf16>
    %127 = vector.shape_cast %126 : vector<1x128x128xbf16> to vector<128x128xbf16>
    %cst_129 = arith.constant dense<0.000000e+00> : vector<64x128xf32>
    %128 = tpu.matmul %125, %127, %cst_129 {dimension_numbers = #tpu.dot_dimension_numbers<[1], [0], [0], [1], [0, 0, 1, 1], [], []>} : vector<64x128xbf16>, vector<128x128xbf16>, vector<64x128xf32> -> vector<64x128xf32>
    %129 = arith.addf %122, %128 : vector<64x128xf32>
    %c0_130 = arith.constant 0 : index
    %c1_131 = arith.constant 1 : index
    %c0_132 = arith.constant 0 : index
    %130 = vector.load %arg7[%c0_130, %c1_131, %c0_132] : memref<10x10x128xf32, #tpu.memory_space<vmem>>, vector<8x8x128xf32>
    %131 = vector.shape_cast %130 : vector<8x8x128xf32> to vector<64x128xf32>
    %132 = arith.truncf %131 : vector<64x128xf32> to vector<64x128xbf16>
    %c1_133 = arith.constant 1 : index
    %c0_134 = arith.constant 0 : index
    %c0_135 = arith.constant 0 : index
    %133 = vector.load %arg4[%c1_133, %c0_134, %c0_135] : memref<9x128x128xbf16, #tpu.memory_space<vmem>>, vector<1x128x128xbf16>
    %134 = vector.shape_cast %133 : vector<1x128x128xbf16> to vector<128x128xbf16>
    %cst_136 = arith.constant dense<0.000000e+00> : vector<64x128xf32>
    %135 = tpu.matmul %132, %134, %cst_136 {dimension_numbers = #tpu.dot_dimension_numbers<[1], [0], [0], [1], [0, 0, 1, 1], [], []>} : vector<64x128xbf16>, vector<128x128xbf16>, vector<64x128xf32> -> vector<64x128xf32>
    %136 = arith.addf %129, %135 : vector<64x128xf32>
    %c0_137 = arith.constant 0 : index
    %c2_138 = arith.constant 2 : index
    %c0_139 = arith.constant 0 : index
    %137 = vector.load %arg7[%c0_137, %c2_138, %c0_139] : memref<10x10x128xf32, #tpu.memory_space<vmem>>, vector<8x8x128xf32>
    %138 = vector.shape_cast %137 : vector<8x8x128xf32> to vector<64x128xf32>
    %139 = arith.truncf %138 : vector<64x128xf32> to vector<64x128xbf16>
    %c2_140 = arith.constant 2 : index
    %c0_141 = arith.constant 0 : index
    %c0_142 = arith.constant 0 : index
    %140 = vector.load %arg4[%c2_140, %c0_141, %c0_142] : memref<9x128x128xbf16, #tpu.memory_space<vmem>>, vector<1x128x128xbf16>
    %141 = vector.shape_cast %140 : vector<1x128x128xbf16> to vector<128x128xbf16>
    %cst_143 = arith.constant dense<0.000000e+00> : vector<64x128xf32>
    %142 = tpu.matmul %139, %141, %cst_143 {dimension_numbers = #tpu.dot_dimension_numbers<[1], [0], [0], [1], [0, 0, 1, 1], [], []>} : vector<64x128xbf16>, vector<128x128xbf16>, vector<64x128xf32> -> vector<64x128xf32>
    %143 = arith.addf %136, %142 : vector<64x128xf32>
    %c1_144 = arith.constant 1 : index
    %c0_145 = arith.constant 0 : index
    %c0_146 = arith.constant 0 : index
    %144 = vector.load %arg7[%c1_144, %c0_145, %c0_146] : memref<10x10x128xf32, #tpu.memory_space<vmem>>, vector<8x8x128xf32>
    %145 = vector.shape_cast %144 : vector<8x8x128xf32> to vector<64x128xf32>
    %146 = arith.truncf %145 : vector<64x128xf32> to vector<64x128xbf16>
    %c3_147 = arith.constant 3 : index
    %c0_148 = arith.constant 0 : index
    %c0_149 = arith.constant 0 : index
    %147 = vector.load %arg4[%c3_147, %c0_148, %c0_149] : memref<9x128x128xbf16, #tpu.memory_space<vmem>>, vector<1x128x128xbf16>
    %148 = vector.shape_cast %147 : vector<1x128x128xbf16> to vector<128x128xbf16>
    %cst_150 = arith.constant dense<0.000000e+00> : vector<64x128xf32>
    %149 = tpu.matmul %146, %148, %cst_150 {dimension_numbers = #tpu.dot_dimension_numbers<[1], [0], [0], [1], [0, 0, 1, 1], [], []>} : vector<64x128xbf16>, vector<128x128xbf16>, vector<64x128xf32> -> vector<64x128xf32>
    %150 = arith.addf %143, %149 : vector<64x128xf32>
    %c1_151 = arith.constant 1 : index
    %c1_152 = arith.constant 1 : index
    %c0_153 = arith.constant 0 : index
    %151 = vector.load %arg7[%c1_151, %c1_152, %c0_153] : memref<10x10x128xf32, #tpu.memory_space<vmem>>, vector<8x8x128xf32>
    %152 = vector.shape_cast %151 : vector<8x8x128xf32> to vector<64x128xf32>
    %153 = arith.truncf %152 : vector<64x128xf32> to vector<64x128xbf16>
    %c4_154 = arith.constant 4 : index
    %c0_155 = arith.constant 0 : index
    %c0_156 = arith.constant 0 : index
    %154 = vector.load %arg4[%c4_154, %c0_155, %c0_156] : memref<9x128x128xbf16, #tpu.memory_space<vmem>>, vector<1x128x128xbf16>
    %155 = vector.shape_cast %154 : vector<1x128x128xbf16> to vector<128x128xbf16>
    %cst_157 = arith.constant dense<0.000000e+00> : vector<64x128xf32>
    %156 = tpu.matmul %153, %155, %cst_157 {dimension_numbers = #tpu.dot_dimension_numbers<[1], [0], [0], [1], [0, 0, 1, 1], [], []>} : vector<64x128xbf16>, vector<128x128xbf16>, vector<64x128xf32> -> vector<64x128xf32>
    %157 = arith.addf %150, %156 : vector<64x128xf32>
    %c1_158 = arith.constant 1 : index
    %c2_159 = arith.constant 2 : index
    %c0_160 = arith.constant 0 : index
    %158 = vector.load %arg7[%c1_158, %c2_159, %c0_160] : memref<10x10x128xf32, #tpu.memory_space<vmem>>, vector<8x8x128xf32>
    %159 = vector.shape_cast %158 : vector<8x8x128xf32> to vector<64x128xf32>
    %160 = arith.truncf %159 : vector<64x128xf32> to vector<64x128xbf16>
    %c5_161 = arith.constant 5 : index
    %c0_162 = arith.constant 0 : index
    %c0_163 = arith.constant 0 : index
    %161 = vector.load %arg4[%c5_161, %c0_162, %c0_163] : memref<9x128x128xbf16, #tpu.memory_space<vmem>>, vector<1x128x128xbf16>
    %162 = vector.shape_cast %161 : vector<1x128x128xbf16> to vector<128x128xbf16>
    %cst_164 = arith.constant dense<0.000000e+00> : vector<64x128xf32>
    %163 = tpu.matmul %160, %162, %cst_164 {dimension_numbers = #tpu.dot_dimension_numbers<[1], [0], [0], [1], [0, 0, 1, 1], [], []>} : vector<64x128xbf16>, vector<128x128xbf16>, vector<64x128xf32> -> vector<64x128xf32>
    %164 = arith.addf %157, %163 : vector<64x128xf32>
    %c2_165 = arith.constant 2 : index
    %c0_166 = arith.constant 0 : index
    %c0_167 = arith.constant 0 : index
    %165 = vector.load %arg7[%c2_165, %c0_166, %c0_167] : memref<10x10x128xf32, #tpu.memory_space<vmem>>, vector<8x8x128xf32>
    %166 = vector.shape_cast %165 : vector<8x8x128xf32> to vector<64x128xf32>
    %167 = arith.truncf %166 : vector<64x128xf32> to vector<64x128xbf16>
    %c6_168 = arith.constant 6 : index
    %c0_169 = arith.constant 0 : index
    %c0_170 = arith.constant 0 : index
    %168 = vector.load %arg4[%c6_168, %c0_169, %c0_170] : memref<9x128x128xbf16, #tpu.memory_space<vmem>>, vector<1x128x128xbf16>
    %169 = vector.shape_cast %168 : vector<1x128x128xbf16> to vector<128x128xbf16>
    %cst_171 = arith.constant dense<0.000000e+00> : vector<64x128xf32>
    %170 = tpu.matmul %167, %169, %cst_171 {dimension_numbers = #tpu.dot_dimension_numbers<[1], [0], [0], [1], [0, 0, 1, 1], [], []>} : vector<64x128xbf16>, vector<128x128xbf16>, vector<64x128xf32> -> vector<64x128xf32>
    %171 = arith.addf %164, %170 : vector<64x128xf32>
    %c2_172 = arith.constant 2 : index
    %c1_173 = arith.constant 1 : index
    %c0_174 = arith.constant 0 : index
    %172 = vector.load %arg7[%c2_172, %c1_173, %c0_174] : memref<10x10x128xf32, #tpu.memory_space<vmem>>, vector<8x8x128xf32>
    %173 = vector.shape_cast %172 : vector<8x8x128xf32> to vector<64x128xf32>
    %174 = arith.truncf %173 : vector<64x128xf32> to vector<64x128xbf16>
    %c7_175 = arith.constant 7 : index
    %c0_176 = arith.constant 0 : index
    %c0_177 = arith.constant 0 : index
    %175 = vector.load %arg4[%c7_175, %c0_176, %c0_177] : memref<9x128x128xbf16, #tpu.memory_space<vmem>>, vector<1x128x128xbf16>
    %176 = vector.shape_cast %175 : vector<1x128x128xbf16> to vector<128x128xbf16>
    %cst_178 = arith.constant dense<0.000000e+00> : vector<64x128xf32>
    %177 = tpu.matmul %174, %176, %cst_178 {dimension_numbers = #tpu.dot_dimension_numbers<[1], [0], [0], [1], [0, 0, 1, 1], [], []>} : vector<64x128xbf16>, vector<128x128xbf16>, vector<64x128xf32> -> vector<64x128xf32>
    %178 = arith.addf %171, %177 : vector<64x128xf32>
    %c2_179 = arith.constant 2 : index
    %c2_180 = arith.constant 2 : index
    %c0_181 = arith.constant 0 : index
    %179 = vector.load %arg7[%c2_179, %c2_180, %c0_181] : memref<10x10x128xf32, #tpu.memory_space<vmem>>, vector<8x8x128xf32>
    %180 = vector.shape_cast %179 : vector<8x8x128xf32> to vector<64x128xf32>
    %181 = arith.truncf %180 : vector<64x128xf32> to vector<64x128xbf16>
    %c8_182 = arith.constant 8 : index
    %c0_183 = arith.constant 0 : index
    %c0_184 = arith.constant 0 : index
    %182 = vector.load %arg4[%c8_182, %c0_183, %c0_184] : memref<9x128x128xbf16, #tpu.memory_space<vmem>>, vector<1x128x128xbf16>
    %183 = vector.shape_cast %182 : vector<1x128x128xbf16> to vector<128x128xbf16>
    %cst_185 = arith.constant dense<0.000000e+00> : vector<64x128xf32>
    %184 = tpu.matmul %181, %183, %cst_185 {dimension_numbers = #tpu.dot_dimension_numbers<[1], [0], [0], [1], [0, 0, 1, 1], [], []>} : vector<64x128xbf16>, vector<128x128xbf16>, vector<64x128xf32> -> vector<64x128xf32>
    %185 = arith.addf %178, %184 : vector<64x128xf32>
    %c0_186 = arith.constant 0 : index
    %c0_187 = arith.constant 0 : index
    %186 = vector.load %arg5[%c0_186, %c0_187] : memref<1x128xf32, #tpu.memory_space<vmem>>, vector<1x128xf32>
    %187 = vector.broadcast %186 : vector<1x128xf32> to vector<64x128xf32>
    %188 = arith.addf %185, %187 : vector<64x128xf32>
    %cst_188 = arith.constant 0.000000e+00 : f32
    %189 = vector.broadcast %cst_188 : f32 to vector<64x128xf32>
    %190 = arith.maximumf %188, %189 : vector<64x128xf32>
    %191 = tpu.iota {dimensions = array<i32: 1>} : vector<64x128xi32>
    %c64_i32 = arith.constant 64 : i32
    %192 = vector.broadcast %c64_i32 : i32 to vector<64x128xi32>
    %193 = arith.cmpi slt, %191, %192 : vector<64x128xi32>
    %194 = arith.select %193, %190, %117 : vector<64x128xi1>, vector<64x128xf32>
    %195 = vector.shape_cast %194 : vector<64x128xf32> to vector<8x8x128xf32>
    %c0_189 = arith.constant 0 : index
    %c0_190 = arith.constant 0 : index
    %c0_191 = arith.constant 0 : index
    %c0_192 = arith.constant 0 : index
    %196 = vector.load %arg6[%c0_189, %c0_190, %c0_191, %c0_192] : memref<1x8x8x128xf32, #tpu.memory_space<vmem>>, vector<1x8x8x128xf32>
    %197 = vector.shape_cast %196 : vector<1x8x8x128xf32> to vector<8x8x128xf32>
    %198 = vector.shape_cast %195 : vector<8x8x128xf32> to vector<1x8x8x128xf32>
    tpu.vector_store %arg6[%c0_189, %c0_190, %c0_191, %c0_192], %198 {strides = array<i32>} : memref<1x8x8x128xf32, #tpu.memory_space<vmem>>, vector<1x8x8x128xf32>,
    return
  }
  func.func @transform_0(%arg0: i32) -> (i32, i32, i32, i32) {
    %c0_i32 = arith.constant 0 : i32
    %c0_i32_0 = arith.constant 0 : i32
    %c0_i32_1 = arith.constant 0 : i32
    %c0_i32_2 = arith.constant 0 : i32
    return %arg0, %c0_i32, %c0_i32_0, %c0_i32_1 : i32, i32, i32, i32
  }
  func.func @transform_1(%arg0: i32) -> (i32, i32, i32) {
    %c0_i32 = arith.constant 0 : i32
    %c0_i32_0 = arith.constant 0 : i32
    %c0_i32_1 = arith.constant 0 : i32
    %c0_i32_2 = arith.constant 0 : i32
    return %c0_i32, %c0_i32_0, %c0_i32_1 : i32, i32, i32
  }
  func.func @transform_2(%arg0: i32) -> (i32, i32) {
    %c0_i32 = arith.constant 0 : i32
    %c0_i32_0 = arith.constant 0 : i32
    %c0_i32_1 = arith.constant 0 : i32
    return %c0_i32, %c0_i32_0 : i32, i32
  }
  func.func @transform_3(%arg0: i32) -> (i32, i32, i32) {
    %c0_i32 = arith.constant 0 : i32
    %c0_i32_0 = arith.constant 0 : i32
    %c0_i32_1 = arith.constant 0 : i32
    %c0_i32_2 = arith.constant 0 : i32
    return %c0_i32, %c0_i32_0, %c0_i32_1 : i32, i32, i32
  }
  func.func @transform_4(%arg0: i32) -> (i32, i32) {
    %c0_i32 = arith.constant 0 : i32
    %c0_i32_0 = arith.constant 0 : i32
    %c0_i32_1 = arith.constant 0 : i32
    return %c0_i32, %c0_i32_0 : i32, i32
  }
  func.func @transform_5(%arg0: i32) -> (i32, i32, i32, i32) {
    %c0_i32 = arith.constant 0 : i32
    %c0_i32_0 = arith.constant 0 : i32
    %c0_i32_1 = arith.constant 0 : i32
    %c0_i32_2 = arith.constant 0 : i32
    return %arg0, %c0_i32, %c0_i32_0, %c0_i32_1 : i32, i32, i32, i32
  }
}

</mosaic_0001>

<bundles_post_ra>
// kernel: inception_z.1
= control target key start
LH: loop header
LB: loop body
LE: loop exit
PB: predicated region body
PF: predicated region fallthrough
CT: control target
= control target key end

     0   :  { %s6250_s18 = smov 0   ;;  %s7785_s0 = inlined_call_operand.vmem [shape: bf16[2,11,11,16], index: 0, kind: input, shape index: {}]   ;;  %s7786_s1 = inlined_call_operand.vmem [shape: bf16[16,16,128], index: 1, kind: input, shape index: {}]   ;;  %s7787_s2 = inlined_call_operand.vmem [shape: f32[1,128], index: 2, kind: input, shape index: {}]   ;;  %s7788_s3 = inlined_call_operand.vmem [shape: bf16[9,128,128], index: 3, kind: input, shape index: {}]   ;;  %s7789_s4 = inlined_call_operand.vmem [shape: f32[1,128], index: 4, kind: input, shape index: {}]   ;;  %s7790_s5 = inlined_call_operand.vmem [shape: f32[2,8,8,128], index: 5, kind: output, shape index: {}]  }
   0x1 LB: > { %s4801_s19 = sadd.s32 4294967295, %s6217_s18   ;;  %p4805_p0 = scmp.ge.s32.totalorder %s6217_s18, 1  ;;  %s6217_s18 = sphi %s6250_s18, %s15_s18  }
   0x2   : > { %p187_p1 = scmp.lt.s32.totalorder %s6217_s18, 3 }
   0x4   : > { %p188_p2 = pnand %p4805_p0, %p187_p1 }
   0x6   : > { %191 = sbr.rel (%p188_p2) target bundleno = 935 (0x3a7), region = 40 }
   0xd   : > { %v6098_v0 = vld [vmem:[%s7786_s1] sm:$0xff]   ;;  %p215_p3 = scmp.lt.s32.totalorder %s4801_s19, 1  ;;  %v6100_v1 = vld [vmem:[%s7786_s1 + $0x10] sm:$0xff]   ;;  %vm380_vm0 = vcmask 130048   ;;  %vm585_vm1 = vcmask 1042432   ;;  %vm586_vm2 = vcmask 1046532  }
   0xe   : > { %5538 = vmatprep.subr.bf16.mxu0 %v6098_v0  ;;  %v6290_v17 = vld [vmem:[%s7786_s1 + $0x18] sm:$0xff]   ;;  %vm6308_vm3 = vmor %vm585_vm1, %vm586_vm2  ;;  %vm734_vm4 = vsmask.f32 2304  ;;  %vm735_vm5 = vsmask.f32 6416 }
   0xf   : > { %s7821_s19 = smov (!%p215_p3, %s4801_s19), 1  ;;  %5539 = vmatpush3.bf16.msra.mxu0 %v6098_v0  ;;  %vm6393_vm6 = vmor %vm734_vm4, %vm735_vm5  ;;  %vm244_vm7 = vsmask.f32 3328  ;;  %vm245_vm8 = vsmask.f32 7440 }
  0x10   : > { %s6088_s24 = smul.u32 88, %s7821_s19  ;;  %5548 = vmatprep.subr.bf16.mxu0 %v6100_v1  ;;  %vm6489_vm9 = vmor %vm244_vm7, %vm245_vm8  ;;  %s5339_s20 = sshll.u32 %s7821_s19, 6 }
  0x11   : > { %s7756_s23 = scalar_lea.vmem %s7790_s5, %s5339_s20 }
  0x12   : > { %s6270_s27 = scalar_lea.vmem %s7785_s0, %s6088_s24 }
  0x13   : > { %v226_v2 = vld [vmem:[%s6270_s27] sm:$0xf]  ;;  %v227_v3 = vld [vmem:[%s6270_s27 + $0x8] sm:$0xf]  ;;  %v228_v4 = vld [vmem:[%s6270_s27 + $0x10] sm:$0xf] }
  0x14   : > { %v248_v5 = vshrl.u32 %v226_v2, 16  ;;  %v251_v6 = vshll.u32 %v226_v2, 16  ;;  %v262_v7 = vshrl.u32 %v227_v3, 16  ;;  %v4820_v8 = vcombine.low %v226_v2, %v227_v3  ;;  %v6276_v9 = vld [vmem:[%s6270_s27 + $0x18] sm:$0xf] }
  0x15   : > { %v265_v10 = vshll.u32 %v227_v3, 16  ;;  %v276_v11 = vshrl.u32 %v228_v4, 16  ;;  %v6279_v12 = vld [vmem:[%s6270_s27 + $0x20] sm:$0xf]  ;;  %v6282_v13 = vld [vmem:[%s6270_s27 + $0x28] sm:$0xf]  ;;  %v4821_v16 = vcombine.low %v228_v4, %v6276_v9 }
  0x16   : > { %5540 = vmatprep.mubr.msk.bf16.mxu0 %vm380_vm0, %v4820_v8  ;;  %v279_v14 = vshll.u32 %v228_v4, 16  ;;  %v290_v15 = vshrl.u32 %v6276_v9, 16  ;;  %v6292_v18 = vrot.slane %v248_v5, 4  ;;  %v4822_v19 = vcombine.low %v6279_v12, %v6282_v13  ;;  %v236_v20 = vld [vmem:[%s6270_s27 + $0x4] sm:$0x1] }
  0x17   : > { %v6297_v21 = vrot.slane %v251_v6, 5  ;;  %v6299_v22 = vrot.slane %v262_v7, 4  ;;  %v6301_v23 = vrot.slane %v265_v10, 5  ;;  %v6303_v24 = vrot.slane %v276_v11, 4  ;;  %5541 = vmatmul.mubr.msk.bf16.vlgmr.msra.gmra.mrb[0].mxu0 %vm380_vm0, %v4821_v16  ;;  %v237_v25 = vld [vmem:[%s6270_s27 + $0xc] sm:$0x1] }
  0x18   : > { %5549 = vmatpush3.bf16.msra.mxu0 %v6100_v1  ;;  %5544 = vmatprep.mubr.msk.bf16.mxu0 %vm380_vm0, %v4822_v19  ;;  %v6314_v27 = vld [vmem:[%s6270_s27 + $0x30] sm:$0xf]  ;;  %v233_v28 = vld [vmem:[%s6270_s27 + $0x38] sm:$0xf]  ;;  %v561_v29 = vld [vmem:[%s6270_s27] sm:$0xe] }
  0x19   : > { %v6318_v30 = vrot.slane %v279_v14, 5  ;;  %v6320_v31 = vrot.slane %v290_v15, 4  ;;  %v6323_v32 = vld [vmem:[%s6270_s27 + $0x8] sm:$0xe]  ;;  %v4829_v33 = vrot.slane %v561_v29, 9  ;;  %v590_v34 = vrot.slane %v236_v20, 5  ;;  %5558 = vmatprep.subr.bf16.mxu0 %v6290_v17 }
  0x1a   : > { %v293_v35 = vshll.u32 %v6276_v9, 16  ;;  %v304_v36 = vshrl.u32 %v6279_v12, 16  ;;  %v4830_v37 = vrot.slane %v6323_v32, 9  ;;  %v594_v38 = vrot.slane %v237_v25, 5  ;;  %v238_v39 = vld [vmem:[%s6270_s27 + $0x14] sm:$0x1] }
  0x1b   : > { %v4823_v40 = vcombine.low %v6314_v27, %v233_v28  ;;  %v591_v41 = vsel %vm6308_vm3, %v4829_v33, %v590_v34  ;;  %v239_v42 = vld [vmem:[%s6270_s27 + $0x1c] sm:$0x1]  ;;  %v6335_v43 = vld [vmem:[%s6270_s27 + $0x10] sm:$0xe]  ;;  %v6338_v44 = vld [vmem:[%s6270_s27 + $0x18] sm:$0xe] }
  0x1c   : > { %v595_v45 = vsel %vm6308_vm3, %v4830_v37, %v594_v38  ;;  %v4831_v46 = vrot.slane %v6335_v43, 9  ;;  %v598_v47 = vrot.slane %v238_v39, 5  ;;  %v4832_v48 = vrot.slane %v6338_v44, 9  ;;  %v240_v49 = vld [vmem:[%s6270_s27 + $0x24] sm:$0x1] }
  0x1d   : > { %v4839_v50 = vcombine.low %v591_v41, %v595_v45  ;;  %v602_v51 = vrot.slane %v239_v42, 5  ;;  %v241_v52 = vld [vmem:[%s6270_s27 + $0x2c] sm:$0x1]  ;;  %v6347_v53 = vld [vmem:[%s6270_s27 + $0x20] sm:$0xe]  ;;  %v606_v54 = vrot.slane %v240_v49, 5 }
  0x1e   : > { %v599_v55 = vsel %vm6308_vm3, %v4831_v46, %v598_v47  ;;  %v6352_v56 = vld [vmem:[%s6270_s27 + $0x28] sm:$0xe]  ;;  %v4833_v57 = vrot.slane %v6347_v53, 9  ;;  %v610_v58 = vrot.slane %v241_v52, 5  ;;  %v242_v59 = vld [vmem:[%s6270_s27 + $0x34] sm:$0x1] }
  0x1f   : > { %5545 = vmatmul.mubr.msk.bf16.gmra.mrb[4].mxu0 %vm380_vm0, %v4823_v40  ;;  %v603_v60 = vsel %vm6308_vm3, %v4832_v48, %v602_v51  ;;  %v4834_v61 = vrot.slane %v6352_v56, 9  ;;  %v243_v62 = vld [vmem:[%s6270_s27 + $0x3c] sm:$0x1]  ;;  %v6362_v63 = vld [vmem:[%s6270_s27 + $0x30] sm:$0xe]  ;;  %v614_v0 = vrot.slane %v242_v59, 5 }
  0x20   : > { %5550 = vmatprep.mubr.msk.bf16.mxu0 %vm380_vm0, %v4839_v50  ;;  %v4840_v1 = vcombine.low %v599_v55, %v603_v60  ;;  %v607_v2 = vsel %vm6308_vm3, %v4833_v57, %v606_v54  ;;  %v6368_v3 = vld [vmem:[%s6270_s27 + $0x38] sm:$0xe]  ;;  %v4835_v4 = vrot.slane %v6362_v63, 9  ;;  %v618_v5 = vrot.slane %v243_v62, 5  ;;  %v726_v6 = vld [vmem:[%s6270_s27 + $0x4] sm:$0x3] }
  0x21   : > { %v611_v7 = vsel %vm6308_vm3, %v4834_v61, %v610_v58  ;;  %v4836_v8 = vrot.slane %v6368_v3, 9  ;;  %v738_v10 = vshrl.u32 %v561_v29, 16  ;;  %v741_v11 = vshll.u32 %v561_v29, 16  ;;  %v727_v16 = vld [vmem:[%s6270_s27 + $0xc] sm:$0x3]  ;;  %v6389_v47 = vld [vmem:[%s7786_s1 + $0x20] sm:$0xff]  }
  0x22   : > { %v4841_v14 = vcombine.low %v607_v2, %v611_v7  ;;  %v6377_v15 = vsel %vm6308_vm3, %v4835_v4, %v614_v0  ;;  %v747_v19 = vshrl.u32 %v726_v6, 16  ;;  %v750_v20 = vshll.u32 %v726_v6, 16  ;;  %v728_v40 = vld [vmem:[%s6270_s27 + $0x14] sm:$0x3]  ;;  %v729_v51 = vld [vmem:[%s6270_s27 + $0x1c] sm:$0x3] }
  0x23   : > { %v619_v25 = vsel %vm6308_vm3, %v4836_v8, %v618_v5  ;;  %v740_v28 = vrot.slane %v738_v10, 5  ;;  %v743_v33 = vrot.slane %v741_v11, 6  ;;  %v756_v34 = vshrl.u32 %v6323_v32, 16  ;;  %v730_v11 = vld [vmem:[%s6270_s27 + $0x24] sm:$0x3]  ;;  %v6137_v48 = vld [vmem:[%s7788_s3 + $0x58] sm:$0xff]  }
  0x24   : > { %v4842_v37 = vcombine.low %v6377_v15, %v619_v25  ;;  %v749_v38 = vrot.slane %v747_v19, 5  ;;  %v752_v29 = vrot.slane %v750_v20, 6  ;;  %v759_v39 = vshll.u32 %v6323_v32, 16 }
  0x25   : > { %v744_v41 = vor.u32 %v743_v33, %v740_v28  ;;  %v758_v42 = vrot.slane %v756_v34, 5  ;;  %v765_v45 = vshrl.u32 %v727_v16, 16  ;;  %v768_v46 = vshll.u32 %v727_v16, 16  ;;  %v731_v34 = vld [vmem:[%s6270_s27 + $0x2c] sm:$0x3] }
  0x26   : > { %v753_v49 = vor.u32 %v752_v29, %v749_v38  ;;  %v761_v50 = vrot.slane %v759_v39, 6  ;;  %v774_v32 = vshrl.u32 %v6335_v43, 16  ;;  %v777_v52 = vshll.u32 %v6335_v43, 16 }
  0x27   : > { %5551 = vmatmul.mubr.msk.bf16.vlgmr.msra.gmra.mrb[0].mxu0 %vm380_vm0, %v4840_v1  ;;  %v745_v54 = vrot.slane %v744_v41, 4  ;;  %v767_v55 = vrot.slane %v765_v45, 5  ;;  %v770_v57 = vrot.slane %v768_v46, 6  ;;  %v783_v58 = vshrl.u32 %v728_v40, 16 }
  0x28   : > { %5559 = vmatpush3.bf16.msra.mxu0 %v6290_v17  ;;  %5554 = vmatprep.mubr.msk.bf16.mxu0 %vm380_vm0, %v4841_v14  ;;  %v762_v59 = vor.u32 %v761_v50, %v758_v42  ;;  %v776_v60 = vrot.slane %v774_v32, 5  ;;  %v779_v61 = vrot.slane %v777_v52, 6  ;;  %v786_v62 = vshll.u32 %v728_v40, 16 }
  0x29   : > { %v754_v0 = vsel %vm6393_vm6, %v745_v54, %v753_v49  ;;  %v771_v2 = vor.u32 %v770_v57, %v767_v55  ;;  %5568 = vmatprep.subr.bf16.mxu0 %v6389_v47  ;;  %v785_v43 = vrot.slane %v783_v58, 5  ;;  %v792_v1 = vshrl.u32 %v6338_v44, 16  ;;  %v732_v57 = vld [vmem:[%s6270_s27 + $0x34] sm:$0x3] }
  0x2a   : > { %v763_v4 = vrot.slane %v762_v59, 4  ;;  %v780_v5 = vor.u32 %v779_v61, %v776_v60  ;;  %v788_v17 = vrot.slane %v786_v62, 6  ;;  %v795_v6 = vshll.u32 %v6338_v44, 16 }
  0x2b   : > { %v794_v7 = vrot.slane %v792_v1, 5  ;;  %v801_v8 = vshrl.u32 %v729_v51, 16  ;;  %v804_v10 = vshll.u32 %v729_v51, 16  ;;  %v810_v14 = vshrl.u32 %v6347_v53, 16 }
  0x2c   : > { %v772_v15 = vsel %vm6393_vm6, %v763_v4, %v771_v2  ;;  %v781_v16 = vrot.slane %v780_v5, 4  ;;  %v789_v19 = vor.u32 %v788_v17, %v785_v43  ;;  %v797_v20 = vrot.slane %v795_v6, 6  ;;  %v733_v43 = vld [vmem:[%s6270_s27 + $0x3c] sm:$0x3] }
  0x2d   : > { %v4850_v25 = vcombine.low %v754_v0, %v772_v15  ;;  %v803_v28 = vrot.slane %v801_v8, 5  ;;  %v806_v33 = vrot.slane %v804_v10, 6  ;;  %v812_v38 = vrot.slane %v810_v14, 5  ;;  %v6430_v10 = vld [vmem:[%s7786_s1 + $0x28] sm:$0xff]  }
  0x2e   : > { %v790_v44 = vsel %vm6393_vm6, %v781_v16, %v789_v19  ;;  %v798_v29 = vor.u32 %v797_v20, %v794_v7  ;;  %v813_v39 = vshll.u32 %v6347_v53, 16  ;;  %v819_v40 = vshrl.u32 %v730_v11, 16 }
  0x2f   : > { %5555 = vmatmul.mubr.msk.bf16.gmra.mrb[4].mxu0 %vm380_vm0, %v4842_v37  ;;  %v807_v41 = vor.u32 %v806_v33, %v803_v28  ;;  %v822_v42 = vshll.u32 %v730_v11, 16  ;;  %v828_v45 = vshrl.u32 %v6352_v56, 16  ;;  %v831_v46 = vshll.u32 %v6352_v56, 16 }
  0x30   : > { %5560 = vmatprep.mubr.msk.bf16.mxu0 %vm380_vm0, %v4850_v25  ;;  %v799_v49 = vrot.slane %v798_v29, 4  ;;  %v815_v50 = vrot.slane %v813_v39, 6  ;;  %v821_v51 = vrot.slane %v819_v40, 5  ;;  %v837_v32 = vshrl.u32 %v731_v34, 16  ;;  %v4880_v29 = vld [vmem:[%s6270_s27 + $0x10] sm:$0xf] }
  0x31   : > { %v824_v52 = vrot.slane %v822_v42, 6  ;;  %v830_v54 = vrot.slane %v828_v45, 5  ;;  %v833_v53 = vrot.slane %v831_v46, 6  ;;  %v840_v55 = vshll.u32 %v731_v34, 16 }
  0x32   : > { %v808_v37 = vsel %vm6393_vm6, %v799_v49, %v807_v41  ;;  %v816_v58 = vor.u32 %v815_v50, %v812_v38  ;;  %v839_v59 = vrot.slane %v837_v32, 5  ;;  %v846_v60 = vshrl.u32 %v6362_v63, 16 }
  0x33   : > { %v4851_v56 = vcombine.low %v790_v44, %v808_v37  ;;  %v825_v61 = vor.u32 %v824_v52, %v821_v51  ;;  %v834_v62 = vor.u32 %v833_v53, %v830_v54  ;;  %v842_v0 = vrot.slane %v840_v55, 6  ;;  %v4882_v52 = vld [vmem:[%s6270_s27 + $0x18] sm:$0xf] }
  0x34   : > { %v817_v2 = vrot.slane %v816_v58, 4  ;;  %v848_v1 = vrot.slane %v846_v60, 5  ;;  %v849_v4 = vshll.u32 %v6362_v63, 16  ;;  %v855_v5 = vshrl.u32 %v732_v57, 16  ;;  %v4878_v63 = vld [vmem:[%s6270_s27 + $0x8] sm:$0xf] }
  0x35   : > { %v835_v17 = vrot.slane %v834_v62, 4  ;;  %v843_v6 = vor.u32 %v842_v0, %v839_v59  ;;  %v858_v7 = vshll.u32 %v732_v57, 16  ;;  %v864_v8 = vshrl.u32 %v6368_v3, 16  ;;  %v6449_v57 = vld [vmem:[%s6270_s27 + $0xc] sm:$0x1] }
  0x36   : > { %v826_v11 = vsel %vm6393_vm6, %v817_v2, %v825_v61  ;;  %v851_v14 = vrot.slane %v849_v4, 6  ;;  %v857_v15 = vrot.slane %v855_v5, 5  ;;  %v867_v16 = vshll.u32 %v6368_v3, 16  ;;  %v6452_v58 = vld [vmem:[%s6270_s27 + $0x14] sm:$0x1] }
  0x37   : > { %5561 = vmatmul.mubr.msk.bf16.vlgmr.msra.gmra.mrb[0].mxu0 %vm380_vm0, %v4851_v56  ;;  %v844_v19 = vsel %vm6393_vm6, %v835_v17, %v843_v6  ;;  %v860_v20 = vrot.slane %v858_v7, 6  ;;  %v866_v25 = vrot.slane %v864_v8, 5  ;;  %v873_v28 = vshrl.u32 %v733_v43, 16  ;;  %v4884_v56 = vld [vmem:[%s6270_s27 + $0x20] sm:$0xf] }
  0x38   : > { %5569 = vmatpush3.bf16.msra.mxu0 %v6389_v47  ;;  %v4852_v33 = vcombine.low %v826_v11, %v844_v19  ;;  %v852_v34 = vor.u32 %v851_v14, %v848_v1  ;;  %v869_v38 = vrot.slane %v867_v16, 6  ;;  %v876_v44 = vshll.u32 %v733_v43, 16  ;;  %v6106_v0 = vld [vmem:[%s6270_s27 + $0x8] ss:$8 sps:$4 sm:$0xff]   ;;  %v6467_v7 = vld [vmem:[%s6270_s27 + $0x1c] sm:$0x1] }
  0x39   : > { %v861_v39 = vor.u32 %v860_v20, %v857_v15  ;;  %v875_v40 = vrot.slane %v873_v28, 5  ;;  %5578 = vmatprep.subr.bf16.mxu0 %v6430_v10  ;;  %v1127_v3 = vshrl.u32 %v4878_v63, 16  ;;  %v1130_v41 = vshll.u32 %v4878_v63, 16  ;;  %v4886_v17 = vld [vmem:[%s6270_s27 + $0x28] sm:$0xf] }
  0x3a   : > { %v307_v42 = vshll.u32 %v6279_v12, 16  ;;  %5564 = vmatprep.mubr.msk.bf16.mxu0 %vm380_vm0, %v4852_v33  ;;  %v853_v45 = vrot.slane %v852_v34, 4  ;;  %v870_v47 = vor.u32 %v869_v38, %v866_v25  ;;  %v878_v46 = vrot.slane %v876_v44, 6  ;;  %v6471_v11 = vld [vmem:[%s6270_s27 + $0x24] sm:$0x1] }
  0x3b   : > { %v318_v49 = vshrl.u32 %v6282_v13, 16  ;;  %v1129_v50 = vrot.slane %v1127_v3, 4  ;;  %v1141_v51 = vshrl.u32 %v4880_v29, 16  ;;  %v1144_v32 = vshll.u32 %v4880_v29, 16  ;;  %v6474_v16 = vld [vmem:[%s6270_s27 + $0x2c] sm:$0x1] }
  0x3c   : > { %v862_v54 = vsel %vm6393_vm6, %v853_v45, %v861_v39  ;;  %v871_v53 = vrot.slane %v870_v47, 4  ;;  %v879_v55 = vor.u32 %v878_v46, %v875_v40  ;;  %v1132_v37 = vrot.slane %v1130_v41, 5  ;;  %v4888_v20 = vld [vmem:[%s6270_s27 + $0x30] sm:$0xf]  ;;  %v4890_v29 = vld [vmem:[%s6270_s27 + $0x38] sm:$0xf] }
  0x3d   : > { %v1143_v59 = vrot.slane %v1141_v51, 4  ;;  %v1146_v60 = vrot.slane %v1144_v32, 5  ;;  %v6457_v61 = vrot.slane %v293_v35, 5  ;;  %v1155_v2 = vshrl.u32 %v4882_v52, 16  ;;  %v6108_v39 = vld [vmem:[%s6270_s27 + $0x18] ss:$8 sps:$4 sm:$0xff]  }
  0x3e   : > { %v880_v62 = vsel %vm6393_vm6, %v871_v53, %v879_v55  ;;  %v1158_v43 = vshll.u32 %v4882_v52, 16  ;;  %v321_v1 = vshll.u32 %v6282_v13, 16  ;;  %v1136_v5 = vshll.u32 %v6449_v57, 16  ;;  %v6109_v52 = vld [vmem:[%s6270_s27 + $0x28] ss:$8 sps:$4 sm:$0xff]  }
  0x3f   : > { %v4853_v4 = vcombine.low %v862_v54, %v880_v62  ;;  %v1133_v6 = vor.u32 %v1132_v37, %v1129_v50  ;;  %v1150_v9 = vshll.u32 %v6452_v58, 16  ;;  %v1169_v35 = vshrl.u32 %v4884_v56, 16  ;;  %v6484_v50 = vld [vmem:[%s6270_s27 + $0x34] sm:$0x1] }
  0x40   : > { %v1147_v8 = vor.u32 %v1146_v60, %v1143_v59  ;;  %v1157_v14 = vrot.slane %v1155_v2, 4  ;;  %v1172_v15 = vshll.u32 %v4884_v56, 16  ;;  %v1160_v63 = vrot.slane %v1158_v43, 5  ;;  %v4892_v59 = vld [vmem:[%s6270_s27 + $0x40] sm:$0xf]  ;;  %v6498_v56 = vld [vmem:[%s7786_s1 + $0x30] sm:$0xff]  }
  0x41   : > { %5565 = vmatmul.mubr.msk.bf16.gmra.mrb[4].mxu0 %vm380_vm0, %v4853_v4  ;;  %v1171_v19 = vrot.slane %v1169_v35, 4  ;;  %v1183_v25 = vshrl.u32 %v4886_v17, 16  ;;  %v1186_v28 = vshll.u32 %v4886_v17, 16  ;;  %v332_v33 = vshrl.u32 %v6314_v27, 16 }
  0x42   : > { %5570 = vmatprep.mubr.msk.bf16.mxu0 %vm380_vm0, %v6106_v0  ;;  %v1138_v34 = vrot.slane %v1136_v5, 5  ;;  %v1164_v38 = vshll.u32 %v6467_v7, 16  ;;  %v1174_v44 = vrot.slane %v1172_v15, 5  ;;  %v1134_v40 = vrot.slane %v1133_v6, 4 }
  0x43   : > { %v1152_v3 = vrot.slane %v1150_v9, 5  ;;  %v1185_v41 = vrot.slane %v1183_v25, 4  ;;  %v1188_v45 = vrot.slane %v1186_v28, 5  ;;  %v1148_v47 = vrot.slane %v1147_v8, 4 }
  0x44   : > { %v1178_v46 = vshll.u32 %v6471_v11, 16  ;;  %v1197_v51 = vshrl.u32 %v4888_v20, 16  ;;  %v1200_v32 = vshll.u32 %v4888_v20, 16  ;;  %v1161_v53 = vor.u32 %v1160_v63, %v1157_v14 }
  0x45   : > { %v1175_v55 = vor.u32 %v1174_v44, %v1171_v19  ;;  %v1192_v37 = vshll.u32 %v6474_v16, 16  ;;  %v1211_v60 = vshrl.u32 %v4890_v29, 16  ;;  %v1189_v62 = vor.u32 %v1188_v45, %v1185_v41  ;;  %v6110_v41 = vld [vmem:[%s6270_s27 + $0x38] ss:$8 sps:$4 sm:$0xff]  }
  0x46   : > { %v1199_v0 = vrot.slane %v1197_v51, 4  ;;  %v1202_v2 = vrot.slane %v1200_v32, 5  ;;  %v1214_v43 = vshll.u32 %v4890_v29, 16  ;;  %v6502_v4 = vrot.slane %v304_v36, 4  ;;  %v6517_v36 = vld [vmem:[%s6270_s27 + $0x3c] sm:$0x1] }
  0x47   : > { %v6506_v5 = vrot.slane %v307_v42, 5  ;;  %v1166_v17 = vrot.slane %v1164_v38, 5  ;;  %v1206_v6 = vshll.u32 %v6484_v50, 16  ;;  %v1139_v9 = vsel %vm6489_vm9, %v1134_v40, %v1138_v34  ;;  %v6521_v34 = vld [vmem:[%s6270_s27 + $0x44] sm:$0x1] }
  0x48   : > { %v1153_v35 = vsel %vm6489_vm9, %v1148_v47, %v1152_v3  ;;  %v1203_v8 = vor.u32 %v1202_v2, %v1199_v0  ;;  %v1225_v14 = vshrl.u32 %v4892_v59, 16  ;;  %v1162_v12 = vrot.slane %v1161_v53, 4  ;;  %v6531_v47 = vld [vmem:[%s6270_s27 + $0x10] sm:$0xe] }
  0x49   : > { %5571 = vmatmul.mubr.msk.bf16.vlgmr.msra.gmra.mrb[0].mxu0 %vm380_vm0, %v6108_v39  ;;  %v1213_v42 = vrot.slane %v1211_v60, 4  ;;  %v1216_v15 = vrot.slane %v1214_v43, 5  ;;  %v1228_v63 = vshll.u32 %v4892_v59, 16  ;;  %v1176_v19 = vrot.slane %v1175_v55, 4  ;;  %v4905_v39 = vld [vmem:[%s6270_s27 + $0x8] sm:$0xe] }
  0x4a   : > { %5579 = vmatpush3.bf16.msra.mxu0 %v6430_v10  ;;  %5574 = vmatprep.mubr.msk.bf16.mxu0 %vm380_vm0, %v6109_v52  ;;  %v1180_v20 = vrot.slane %v1178_v46, 5  ;;  %v1190_v25 = vrot.slane %v1189_v62, 4  ;;  %v1194_v28 = vrot.slane %v1192_v37, 5  ;;  %v1204_v10 = vrot.slane %v1203_v8, 4  ;;  %v6543_v59 = vld [vmem:[%s6270_s27 + $0x18] sm:$0xe] }
  0x4b   : > { %5588 = vmatprep.subr.bf16.mxu0 %v6498_v56  ;;  %v1208_v38 = vrot.slane %v1206_v6, 5  ;;  %v1227_v44 = vrot.slane %v1225_v14, 4  ;;  %v1230_v29 = vrot.slane %v1228_v63, 5  ;;  %v6526_v40 = vrot.slane %v318_v49, 4  ;;  %v6550_v43 = vld [vmem:[%s6270_s27 + $0x20] sm:$0xe] }
  0x4c   : > { %v335_v3 = vshll.u32 %v6314_v27, 16  ;;  %v4896_v45 = vcombine.low %v1139_v9, %v1153_v35  ;;  %v1167_v46 = vsel %vm6489_vm9, %v1162_v12, %v1166_v17  ;;  %v1217_v51 = vor.u32 %v1216_v15, %v1213_v42  ;;  %v6554_v17 = vld [vmem:[%s6270_s27 + $0x28] sm:$0xe]  ;;  %v4932_v6 = vld [vmem:[%s6270_s27 + $0xc] sm:$0x3] }
  0x4d   : > { %v1220_v32 = vshll.u32 %v6517_v36, 16  ;;  %v1234_v52 = vshll.u32 %v6521_v34, 16  ;;  %v1181_v49 = vsel %vm6489_vm9, %v1176_v19, %v1180_v20  ;;  %v1195_v53 = vsel %vm6489_vm9, %v1190_v25, %v1194_v28  ;;  %v6560_v14 = vld [vmem:[%s6270_s27 + $0x30] sm:$0xe] }
  0x4e   : > { %v4913_v55 = vrot.slane %v4905_v39, 9  ;;  %v1370_v37 = vrot.slane %v6449_v57, 5  ;;  %v1209_v60 = vsel %vm6489_vm9, %v1204_v10, %v1208_v38  ;;  %v1231_v62 = vor.u32 %v1230_v29, %v1227_v44 }
  0x4f   : > { %v4914_v0 = vrot.slane %v6531_v47, 9  ;;  %v1374_v2 = vrot.slane %v6452_v58, 5  ;;  %v1218_v57 = vrot.slane %v1217_v51, 4  ;;  %v1222_v9 = vrot.slane %v1220_v32, 5 }
  0x50   : > { %v1236_v35 = vrot.slane %v1234_v52, 5  ;;  %v4915_v8 = vrot.slane %v6543_v59, 9  ;;  %v4897_v12 = vcombine.low %v1167_v46, %v1181_v49  ;;  %v4898_v42 = vcombine.low %v1195_v53, %v1209_v60 }
  0x51   : > { %5575 = vmatmul.mubr.msk.bf16.gmra.mrb[4].mxu0 %vm380_vm0, %v6110_v41  ;;  %v1378_v58 = vrot.slane %v6467_v7, 5  ;;  %v4916_v15 = vrot.slane %v6550_v43, 9  ;;  %v1232_v63 = vrot.slane %v1231_v62, 4  ;;  %v6566_v19 = vsel %vm6308_vm3, %v4913_v55, %v1370_v37  ;;  %v6576_v41 = vld [vmem:[%s6270_s27 + $0x38] sm:$0xe] }
  0x52   : > { %5580 = vmatprep.mubr.msk.bf16.mxu0 %vm380_vm0, %v4896_v45  ;;  %v6570_v20 = vsel %vm6308_vm3, %v4914_v0, %v1374_v2  ;;  %v1382_v25 = vrot.slane %v6471_v11, 5  ;;  %v1515_v28 = vshrl.u32 %v4905_v39, 16  ;;  %v1518_v10 = vshll.u32 %v4905_v39, 16  ;;  %v6583_v11 = vld [vmem:[%s7786_s1 + $0x38] sm:$0xff]   ;;  %v6598_v55 = vld [vmem:[%s6270_s27 + $0x40] sm:$0xe] }
  0x53   : > { %v1524_v38 = vshrl.u32 %v4932_v6, 16  ;;  %v1527_v44 = vshll.u32 %v4932_v6, 16  ;;  %v4917_v7 = vrot.slane %v6554_v17, 9  ;;  %v1386_v29 = vrot.slane %v6474_v16, 5  ;;  %v4933_v37 = vld [vmem:[%s6270_s27 + $0x14] sm:$0x3] }
  0x54   : > { %v1533_v45 = vshrl.u32 %v6531_v47, 16  ;;  %v1536_v46 = vshll.u32 %v6531_v47, 16  ;;  %v4918_v39 = vrot.slane %v6560_v14, 9  ;;  %v1390_v51 = vrot.slane %v6484_v50, 5  ;;  %v4934_v2 = vld [vmem:[%s6270_s27 + $0x1c] sm:$0x3] }
  0x55   : > { %v1517_v32 = vrot.slane %v1515_v28, 5  ;;  %v1520_v52 = vrot.slane %v1518_v10, 6  ;;  %v1223_v16 = vsel %vm6489_vm9, %v1218_v57, %v1222_v9  ;;  %v1237_v49 = vsel %vm6489_vm9, %v1232_v63, %v1236_v35 }
  0x56   : > { %v4923_v47 = vcombine.low %v6566_v19, %v6570_v20  ;;  %v6595_v53 = vsel %vm6308_vm3, %v4915_v8, %v1378_v58  ;;  %v4919_v50 = vrot.slane %v6576_v41, 9  ;;  %v1394_v60 = vrot.slane %v6517_v36, 5 }
  0x57   : > { %v1526_v62 = vrot.slane %v1524_v38, 5  ;;  %v1529_v0 = vrot.slane %v1527_v44, 6  ;;  %v6609_v6 = vsel %vm6308_vm3, %v4916_v15, %v1382_v25  ;;  %v1521_v57 = vor.u32 %v1520_v52, %v1517_v32 }
  0x58   : > { %v1535_v9 = vrot.slane %v1533_v45, 5  ;;  %v1538_v35 = vrot.slane %v1536_v46, 6  ;;  %v6614_v8 = vsel %vm6308_vm3, %v4917_v7, %v1386_v29  ;;  %v6618_v36 = vsel %vm6308_vm3, %v4918_v39, %v1390_v51 }
  0x59   : > { %5581 = vmatmul.mubr.msk.bf16.vlgmr.msra.gmra.mrb[0].mxu0 %vm380_vm0, %v4897_v12  ;;  %v1545_v12 = vshll.u32 %v4933_v37, 16  ;;  %v1554_v58 = vshll.u32 %v6543_v59, 16  ;;  %v1560_v15 = vshrl.u32 %v4934_v2, 16  ;;  %v1563_v63 = vshll.u32 %v4934_v2, 16 }
  0x5a   : > { %5589 = vmatpush3.bf16.msra.mxu0 %v6498_v56  ;;  %5584 = vmatprep.mubr.msk.bf16.mxu0 %vm380_vm0, %v4898_v42  ;;  %v1542_v56 = vshrl.u32 %v4933_v37, 16  ;;  %v1551_v42 = vshrl.u32 %v6543_v59, 16  ;;  %v4899_v19 = vcombine.low %v1223_v16, %v1237_v49  ;;  %v4924_v20 = vcombine.low %v6595_v53, %v6609_v6  ;;  %v4935_v59 = vld [vmem:[%s6270_s27 + $0x24] sm:$0x3]  ;;  %v4936_v53 = vld [vmem:[%s6270_s27 + $0x2c] sm:$0x3] }
  0x5b   : > { %5598 = vmatprep.subr.bf16.mxu0 %v6583_v11  ;;  %v4920_v25 = vrot.slane %v6598_v55, 9  ;;  %v1398_v28 = vrot.slane %v6521_v34, 5  ;;  %v4925_v10 = vcombine.low %v6614_v8, %v6618_v36  ;;  %v1522_v38 = vrot.slane %v1521_v57, 4 }
  0x5c   : > { %v1530_v44 = vor.u32 %v1529_v0, %v1526_v62  ;;  %v1539_v7 = vor.u32 %v1538_v35, %v1535_v9  ;;  %v1544_v29 = vrot.slane %v1542_v56, 5  ;;  %v1547_v45 = vrot.slane %v1545_v12, 6 }
  0x5d   : > { %v1569_v46 = vshrl.u32 %v6550_v43, 16  ;;  %v1572_v39 = vshll.u32 %v6550_v43, 16  ;;  %v1553_v51 = vrot.slane %v1551_v42, 5  ;;  %v1556_v32 = vrot.slane %v1554_v58, 6 }
  0x5e   : > { %v6631_v52 = vrot.slane %v1560_v15, 5  ;;  %v6633_v34 = vrot.slane %v1563_v63, 6  ;;  %v6638_v16 = vsel %vm6308_vm3, %v4919_v50, %v1394_v60  ;;  %v6642_v49 = vsel %vm6308_vm3, %v4920_v25, %v1398_v28  ;;  %v4937_v50 = vld [vmem:[%s6270_s27 + $0x34] sm:$0x3]  ;;  %v4938_v15 = vld [vmem:[%s6270_s27 + $0x3c] sm:$0x3] }
  0x5f   : > { %v1587_v37 = vshrl.u32 %v6554_v17, 16  ;;  %v1590_v43 = vshll.u32 %v6554_v17, 16  ;;  %v6650_v62 = vsel %vm6393_vm6, %v1522_v38, %v1530_v44  ;;  %v1540_v0 = vrot.slane %v1539_v7, 4 }
  0x60   : > { %v1578_v2 = vshrl.u32 %v4935_v59, 16  ;;  %v1605_v60 = vshrl.u32 %v6560_v14, 16  ;;  %v1571_v6 = vrot.slane %v1569_v46, 5  ;;  %v1574_v57 = vrot.slane %v1572_v39, 6 }
  0x61   : > { %5585 = vmatmul.mubr.msk.bf16.gmra.mrb[4].mxu0 %vm380_vm0, %v4899_v19  ;;  %v1581_v9 = vshll.u32 %v4935_v59, 16  ;;  %v1608_v35 = vshll.u32 %v6560_v14, 16  ;;  %v1548_v8 = vor.u32 %v1547_v45, %v1544_v29  ;;  %v1557_v36 = vor.u32 %v1556_v32, %v1553_v51  ;;  %v6661_v14 = vld [vmem:[%s7786_s1 + $0x40] sm:$0xff]  }
  0x62   : > { %5590 = vmatprep.mubr.msk.bf16.mxu0 %vm380_vm0, %v4923_v47  ;;  %v1566_v17 = vor.u32 %v6633_v34, %v6631_v52  ;;  %v1596_v47 = vshrl.u32 %v4936_v53, 16  ;;  %v1589_v56 = vrot.slane %v1587_v37, 5  ;;  %v1592_v12 = vrot.slane %v1590_v43, 6  ;;  %v4939_v34 = vld [vmem:[%s6270_s27 + $0x44] sm:$0x3] }
  0x63   : > { %v1599_v42 = vshll.u32 %v4936_v53, 16  ;;  %v1614_v58 = vshrl.u32 %v4937_v50, 16  ;;  %v1580_v63 = vrot.slane %v1578_v2, 5  ;;  %v1607_v19 = vrot.slane %v1605_v60, 5 }
  0x64   : > { %v1610_v25 = vrot.slane %v1608_v35, 6  ;;  %v1617_v28 = vshll.u32 %v4937_v50, 16  ;;  %v1575_v38 = vor.u32 %v1574_v57, %v1571_v6  ;;  %v1583_v44 = vrot.slane %v1581_v9, 6 }
  0x65   : > { %v1623_v7 = vshrl.u32 %v6576_v41, 16  ;;  %v1626_v29 = vshll.u32 %v6576_v41, 16  ;;  %v1549_v45 = vsel %vm6393_vm6, %v1540_v0, %v1548_v8  ;;  %v1558_v59 = vrot.slane %v1557_v36, 4 }
  0x66   : > { %v1598_v46 = vrot.slane %v1596_v47, 5  ;;  %v1641_v39 = vshrl.u32 %v6598_v55, 16  ;;  %v1593_v51 = vor.u32 %v1592_v12, %v1589_v56  ;;  %v1601_v32 = vrot.slane %v1599_v42, 6 }
  0x67   : > { %v1616_v52 = vrot.slane %v1614_v58, 5  ;;  %v1644_v53 = vshll.u32 %v6598_v55, 16  ;;  %v1611_v41 = vor.u32 %v1610_v25, %v1607_v19  ;;  %v1619_v37 = vrot.slane %v1617_v28, 6  ;;  %v4970_v55 = vld [vmem:[%s6270_s27 + $0x10] sm:$0xf] }
  0x68   : > { %v1632_v43 = vshrl.u32 %v4938_v15, 16  ;;  %v1635_v0 = vshll.u32 %v4938_v15, 16  ;;  %v1576_v2 = vrot.slane %v1575_v38, 4  ;;  %v1584_v50 = vor.u32 %v1583_v44, %v1580_v63  ;;  %v4972_v25 = vld [vmem:[%s6270_s27 + $0x18] sm:$0xf] }
  0x69   : > { %5591 = vmatmul.mubr.msk.bf16.vlgmr.msra.gmra.mrb[0].mxu0 %vm380_vm0, %v4924_v20  ;;  %v1625_v20 = vrot.slane %v1623_v7, 5  ;;  %v1628_v60 = vrot.slane %v1626_v29, 6  ;;  %v1643_v6 = vrot.slane %v1641_v39, 5  ;;  %v1646_v57 = vrot.slane %v1644_v53, 6  ;;  %v6693_v44 = vld [vmem:[%s6270_s27 + $0x14] sm:$0x1] }
  0x6a   : > { %5599 = vmatpush3.bf16.msra.mxu0 %v6583_v11  ;;  %5594 = vmatprep.mubr.msk.bf16.mxu0 %vm380_vm0, %v4925_v10  ;;  %v1650_v9 = vshrl.u32 %v4939_v34, 16  ;;  %v1653_v35 = vshll.u32 %v4939_v34, 16  ;;  %v4926_v11 = vcombine.low %v6638_v16, %v6642_v49  ;;  %v4942_v10 = vcombine.low %v6650_v62, %v1549_v45  ;;  %v6696_v7 = vld [vmem:[%s6270_s27 + $0x1c] sm:$0x1]  ;;  %v4980_v34 = vld [vmem:[%s6270_s27 + $0x38] sm:$0xf] }
  0x6b   : > { %5608 = vmatprep.subr.bf16.mxu0 %v6661_v14  ;;  %v1594_v8 = vrot.slane %v1593_v51, 4  ;;  %v1602_v36 = vor.u32 %v1601_v32, %v1598_v46  ;;  %v1612_v47 = vrot.slane %v1611_v41, 4  ;;  %v1620_v56 = vor.u32 %v1619_v37, %v1616_v52  ;;  %v4978_v46 = vld [vmem:[%s6270_s27 + $0x30] sm:$0xf] }
  0x6c   : > { %v1634_v12 = vrot.slane %v1632_v43, 5  ;;  %v1637_v42 = vrot.slane %v1635_v0, 6  ;;  %v1567_v58 = vsel %vm6393_vm6, %v1558_v59, %v1566_v17  ;;  %v1585_v15 = vsel %vm6393_vm6, %v1576_v2, %v1584_v50  ;;  %v4974_v59 = vld [vmem:[%s6270_s27 + $0x20] sm:$0xf]  ;;  %v6711_v0 = vld [vmem:[%s7786_s1 + $0x48] sm:$0xff]  }
  0x6d   : > { %v1629_v63 = vor.u32 %v1628_v60, %v1625_v20  ;;  %v1904_v19 = vshrl.u32 %v4970_v55, 16  ;;  %v1647_v16 = vor.u32 %v1646_v57, %v1643_v6  ;;  %v1652_v49 = vrot.slane %v1650_v9, 5 }
  0x6e   : > { %v1655_v62 = vrot.slane %v1653_v35, 6  ;;  %v1907_v28 = vshll.u32 %v4970_v55, 16  ;;  %v6685_v38 = vrot.slane %v321_v1, 5  ;;  %v6689_v17 = vrot.slane %v332_v33, 4  ;;  %v4976_v33 = vld [vmem:[%s6270_s27 + $0x28] sm:$0xf] }
  0x6f   : > { %v4943_v29 = vcombine.low %v1567_v58, %v1585_v15  ;;  %v1603_v45 = vsel %vm6393_vm6, %v1594_v8, %v1602_v36  ;;  %v1621_v13 = vsel %vm6393_vm6, %v1612_v47, %v1620_v56  ;;  %v1638_v1 = vor.u32 %v1637_v42, %v1634_v12  ;;  %v6129_v55 = vld [vmem:[%s7786_s1 + $0x8] sm:$0xff]   ;;  %v6720_v36 = vld [vmem:[%s6270_s27 + $0x24] sm:$0x1]  ;;  %v4982_v15 = vld [vmem:[%s6270_s27 + $0x40] sm:$0xf] }
  0x70   : > { %7797 = vst [vmem:[#allocation3_spill] sm:$0xff] %v6689_v17  ;;  %v1630_v39 = vrot.slane %v1629_v63, 4  ;;  %v1906_v51 = vrot.slane %v1904_v19, 4  ;;  %v1918_v32 = vshrl.u32 %v4972_v25, 16  ;;  %v1921_v52 = vshll.u32 %v4972_v25, 16  ;;  %5528 = vmatprep.subr.bf16.mxu1 %v6129_v55 }
  0x71   : > { %5595 = vmatmul.mubr.msk.bf16.gmra.mrb[4].mxu0 %vm380_vm0, %v4926_v11  ;;  %v1648_v53 = vrot.slane %v1647_v16, 4  ;;  %v1656_v41 = vor.u32 %v1655_v62, %v1652_v49  ;;  %v1909_v37 = vrot.slane %v1907_v28, 5  ;;  %v1913_v43 = vshll.u32 %v6693_v44, 16  ;;  %v6723_v47 = vld [vmem:[%s6270_s27 + $0x2c] sm:$0x1]  ;;  %5529 = vmatpush3.bf16.msra.mxu1 %v6129_v55 }
  0x72   : > { %5600 = vmatprep.mubr.msk.bf16.mxu0 %vm380_vm0, %v4942_v10  ;;  %v1932_v2 = vshrl.u32 %v4974_v59, 16  ;;  %v1935_v50 = vshll.u32 %v4974_v59, 16  ;;  %v1946_v20 = vshrl.u32 %v4976_v33, 16  ;;  %v1949_v60 = vshll.u32 %v4976_v33, 16  ;;  %v6738_v59 = vld [vmem:[%s6270_s27 + $0x3c] sm:$0x1] }
  0x73   : > { %v4944_v6 = vcombine.low %v1603_v45, %v1621_v13  ;;  %v1927_v57 = vshll.u32 %v6696_v7, 16  ;;  %v1960_v9 = vshrl.u32 %v4978_v46, 16  ;;  %v1963_v35 = vshll.u32 %v4978_v46, 16 }
  0x74   : > { %v1639_v11 = vsel %vm6393_vm6, %v1630_v39, %v1638_v1  ;;  %v1920_v10 = vrot.slane %v1918_v32, 4  ;;  %v1923_v8 = vrot.slane %v1921_v52, 5  ;;  %v1657_v56 = vsel %vm6393_vm6, %v1648_v53, %v1656_v41  ;;  %v6735_v1 = vld [vmem:[%s6270_s27 + $0x34] sm:$0x1]  ;;  %v4984_v41 = vld [vmem:[%s6270_s27 + $0x48] sm:$0xf] }
  0x75   : > { %v6727_v12 = vrot.slane %v1913_v43, 5  ;;  %v1974_v42 = vshrl.u32 %v4980_v34, 16  ;;  %v1977_v58 = vshll.u32 %v4980_v34, 16  ;;  %v1934_v63 = vrot.slane %v1932_v2, 4 }
  0x76   : > { %v1937_v19 = vrot.slane %v1935_v50, 5  ;;  %v1948_v16 = vrot.slane %v1946_v20, 4  ;;  %v1951_v49 = vrot.slane %v1949_v60, 5  ;;  %v1962_v62 = vrot.slane %v1960_v9, 4  ;;  %v6749_v20 = vld [vmem:[%s6270_s27 + $0x44] sm:$0x1] }
  0x77   : > { %v1965_v25 = vrot.slane %v1963_v35, 5  ;;  %v1976_v28 = vrot.slane %v1974_v42, 4  ;;  %v1979_v45 = vrot.slane %v1977_v58, 5  ;;  %v1910_v13 = vor.u32 %v1909_v37, %v1906_v51  ;;  %v6114_v51 = vld [vmem:[%s6270_s27 + $0x10] ss:$8 sps:$4 sm:$0xff]  }
  0x78   : > { %v1988_v33 = vshrl.u32 %v4982_v15, 16  ;;  %v1991_v46 = vshll.u32 %v4982_v15, 16  ;;  %v1955_v39 = vshll.u32 %v6723_v47, 16  ;;  %v4945_v32 = vcombine.low %v1639_v11, %v1657_v56  ;;  %v6752_v11 = vld [vmem:[%s6270_s27 + $0x4c] sm:$0x1]  ;;  %v6759_v15 = vld [vmem:[%s7788_s3] sm:$0xff]  }
  0x79   : > { %5601 = vmatmul.mubr.msk.bf16.vlgmr.msra.gmra.mrb[0].mxu0 %vm380_vm0, %v4943_v29  ;;  %v1924_v29 = vor.u32 %v1923_v8, %v1920_v10  ;;  %v6742_v52 = vrot.slane %v1927_v57, 5  ;;  %v1938_v34 = vor.u32 %v1937_v19, %v1934_v63  ;;  %v1952_v53 = vor.u32 %v1951_v49, %v1948_v16  ;;  %5712 = vmatprep.subr.bf16.mxu1 %v6759_v15 }
  0x7a   : > { %5609 = vmatpush3.bf16.msra.mxu0 %v6661_v14  ;;  %5604 = vmatprep.mubr.msk.bf16.mxu0 %vm380_vm0, %v4944_v6  ;;  %v1941_v14 = vshll.u32 %v6720_v36, 16  ;;  %v1966_v37 = vor.u32 %v1965_v25, %v1962_v62  ;;  %v1969_v43 = vshll.u32 %v6735_v1, 16  ;;  %v1980_v2 = vor.u32 %v1979_v45, %v1976_v28  ;;  %v6202_v25 = vld [vmem:[%s6270_s27 + $0x38] sm:$0xf] }
  0x7b   : > { %5618 = vmatprep.subr.bf16.mxu0 %v6711_v0  ;;  %v1983_v50 = vshll.u32 %v6738_v59, 16  ;;  %v1911_v60 = vrot.slane %v1910_v13, 4  ;;  %v1925_v6 = vrot.slane %v1924_v29, 4  ;;  %v1990_v9 = vrot.slane %v1988_v33, 4  ;;  %v4997_v29 = vld [vmem:[%s6270_s27 + $0x10] sm:$0xe] }
  0x7c   : > { %v1993_v35 = vrot.slane %v1991_v46, 5  ;;  %v1943_v55 = vrot.slane %v1941_v14, 5  ;;  %v1957_v57 = vrot.slane %v1955_v39, 5  ;;  %v2002_v10 = vshrl.u32 %v4984_v41, 16  ;;  %v4998_v14 = vld [vmem:[%s6270_s27 + $0x18] sm:$0xe] }
  0x7d   : > { %v2005_v8 = vshll.u32 %v4984_v41, 16  ;;  %v1939_v56 = vrot.slane %v1938_v34, 4  ;;  %v1953_v42 = vrot.slane %v1952_v53, 4  ;;  %v1997_v58 = vshll.u32 %v6749_v20, 16  ;;  %v6777_v39 = vld [vmem:[%s6270_s27 + $0x20] sm:$0xe] }
  0x7e   : > { %v1967_v63 = vrot.slane %v1966_v37, 4  ;;  %v1971_v19 = vrot.slane %v1969_v43, 5  ;;  %v1981_v16 = vrot.slane %v1980_v2, 4  ;;  %v1985_v49 = vrot.slane %v1983_v50, 5  ;;  %v6117_v37 = vld [vmem:[%s6270_s27 + $0x30] ss:$8 sps:$4 sm:$0xff]  }
  0x7f   : > { %v6764_v62 = vrot.slane %v335_v3, 5  ;;  %v346_v28 = vshrl.u32 %v6202_v25, 16  ;;  %v349_v45 = vshll.u32 %v6202_v25, 16  ;;  %v1994_v13 = vor.u32 %v1993_v35, %v1990_v9 }
  0x80   : > { %v1916_v33 = vsel %vm6489_vm9, %v1911_v60, %v6727_v12  ;;  %v1930_v46 = vsel %vm6489_vm9, %v1925_v6, %v6742_v52  ;;  %v2004_v27 = vrot.slane %v2002_v10, 4  ;;  %v2007_v3 = vrot.slane %v2005_v8, 5  ;;  %v6799_v60 = vld [vmem:[%s7786_s1 + $0x50] sm:$0xff]  }
  0x81   : > { %5605 = vmatmul.mubr.msk.bf16.gmra.mrb[4].mxu0 %vm380_vm0, %v4945_v32  ;;  %7798 = vst [vmem:[#allocation4_spill] sm:$0xff] %v6764_v62  ;;  %v6116_v32 = vld [vmem:[%s6270_s27 + $0x20] ss:$8 sps:$4 sm:$0xff]   ;;  %v1944_v34 = vsel %vm6489_vm9, %v1939_v56, %v1943_v55  ;;  %v1958_v53 = vsel %vm6489_vm9, %v1953_v42, %v1957_v57  ;;  %v6784_v41 = vrot.slane %v1997_v58, 5  ;;  %v2011_v12 = vshll.u32 %v6752_v11, 16 }
  0x82   : > { %5610 = vmatprep.mubr.msk.bf16.mxu0 %vm380_vm0, %v6114_v51  ;;  %v6788_v51 = vld [vmem:[%s6270_s27 + $0x28] sm:$0xe]  ;;  %v1972_v52 = vsel %vm6489_vm9, %v1967_v63, %v1971_v19  ;;  %v1986_v43 = vsel %vm6489_vm9, %v1981_v16, %v1985_v49  ;;  %v5005_v2 = vrot.slane %v4997_v29, 9  ;;  %v2147_v50 = vrot.slane %v6693_v44, 5  ;;  %v5024_v19 = vld [vmem:[%s6270_s27 + $0x14] sm:$0x3] }
  0x83   : > { %v1995_v6 = vrot.slane %v1994_v13, 4  ;;  %v5006_v9 = vrot.slane %v4998_v14, 9  ;;  %v2151_v35 = vrot.slane %v6696_v7, 5  ;;  %v5007_v55 = vrot.slane %v6777_v39, 9  ;;  %v6118_v49 = vld [vmem:[%s6270_s27 + $0x40] ss:$8 sps:$4 sm:$0xff]  }
  0x84   : > { %v2008_v57 = vor.u32 %v2007_v3, %v2004_v27  ;;  %v2155_v10 = vrot.slane %v6720_v36, 5  ;;  %v5008_v8 = vrot.slane %v6788_v51, 9  ;;  %v2159_v44 = vrot.slane %v6723_v47, 5  ;;  %v6829_v13 = vld [vmem:[%s6270_s27 + $0x30] sm:$0xe] }
  0x85   : > { %v6806_v56 = vrot.slane %v346_v28, 4  ;;  %v6808_v42 = vrot.slane %v349_v45, 5  ;;  %v2292_v58 = vshrl.u32 %v4997_v29, 16  ;;  %v2295_v7 = vshll.u32 %v4997_v29, 16  ;;  %v5025_v29 = vld [vmem:[%s6270_s27 + $0x1c] sm:$0x3] }
  0x86   : > { %v4988_v63 = vcombine.low %v1916_v33, %v1930_v46  ;;  %v6813_v36 = vcombine.low %v1944_v34, %v1958_v53  ;;  %v2310_v47 = vshrl.u32 %v4998_v14, 16  ;;  %v2313_v16 = vshll.u32 %v4998_v14, 16  ;;  %v6844_v14 = vld [vmem:[%s6270_s27 + $0x38] sm:$0xe]  ;;  %v7003_v62 = vld [vmem:[%s6270_s27 + $0x4c] sm:$0x1] }
  0x87   : > { %7799 = vst [vmem:[#allocation5_spill] sm:$0xff] %v6806_v56  ;;  %7800 = vst [vmem:[#allocation6_spill] sm:$0xff] %v6808_v42  ;;  %v6818_v25 = vcombine.low %v1972_v52, %v1986_v43  ;;  %v2013_v28 = vrot.slane %v2011_v12, 5  ;;  %v6822_v45 = vsel %vm6308_vm3, %v5005_v2, %v2147_v50  ;;  %v2000_v33 = vsel %vm6489_vm9, %v1995_v6, %v6784_v41  ;;  %v6849_v6 = vld [vmem:[%s6270_s27 + $0x40] sm:$0xe] }
  0x88   : > { %v2009_v46 = vrot.slane %v2008_v57, 4  ;;  %v6837_v27 = vsel %vm6308_vm3, %v5007_v55, %v2155_v10  ;;  %v6841_v3 = vsel %vm6308_vm3, %v5008_v8, %v2159_v44  ;;  %v2297_v34 = vrot.slane %v2295_v7, 6  ;;  %v6863_v44 = vld [vmem:[%s6270_s27 + $0x48] sm:$0xe] }
  0x89   : > { %5611 = vmatmul.mubr.msk.bf16.vlgmr.msra.gmra.mrb[0].mxu0 %vm380_vm0, %v6116_v32  ;;  %v2294_v32 = vrot.slane %v2292_v58, 5  ;;  %v2301_v53 = vshrl.u32 %v5024_v19, 16  ;;  %v2304_v12 = vshll.u32 %v5024_v19, 16  ;;  %v2315_v52 = vrot.slane %v2313_v16, 6 }
  0x8a   : > { %5619 = vmatpush3.bf16.msra.mxu0 %v6711_v0  ;;  %5614 = vmatprep.mubr.msk.bf16.mxu0 %vm380_vm0, %v6117_v37  ;;  %v6826_v0 = vsel %vm6308_vm3, %v5006_v9, %v2151_v35  ;;  %v2312_v37 = vrot.slane %v2310_v47, 5  ;;  %v2319_v43 = vshrl.u32 %v5025_v29, 16  ;;  %v2322_v41 = vshll.u32 %v5025_v29, 16 }
  0x8b   : > { %5628 = vmatprep.subr.bf16.mxu0 %v6799_v60  ;;  %v5009_v2 = vrot.slane %v6829_v13, 9  ;;  %v2163_v50 = vrot.slane %v6735_v1, 5  ;;  %v2328_v9 = vshrl.u32 %v6777_v39, 16  ;;  %v2331_v35 = vshll.u32 %v6777_v39, 16 }
  0x8c   : > { %v2014_v55 = vsel %vm6489_vm9, %v2009_v46, %v2013_v28  ;;  %v5010_v8 = vrot.slane %v6844_v14, 9  ;;  %v2167_v1 = vrot.slane %v6738_v59, 5  ;;  %v2298_v39 = vor.u32 %v2297_v34, %v2294_v32  ;;  %v5026_v59 = vld [vmem:[%s6270_s27 + $0x24] sm:$0x3] }
  0x8d   : > { %v2303_v58 = vrot.slane %v2301_v53, 5  ;;  %v2306_v7 = vrot.slane %v2304_v12, 6  ;;  %v5011_v19 = vrot.slane %v6849_v6, 9  ;;  %v2316_v47 = vor.u32 %v2315_v52, %v2312_v37  ;;  %v5027_v53 = vld [vmem:[%s6270_s27 + $0x2c] sm:$0x3] }
  0x8e   : > { %v2321_v16 = vrot.slane %v2319_v43, 5  ;;  %v2324_v28 = vrot.slane %v2322_v41, 6  ;;  %v6867_v29 = vcombine.low %v2000_v33, %v2014_v55  ;;  %v2330_v46 = vrot.slane %v2328_v9, 5  ;;  %v6887_v9 = vld [vmem:[%s7786_s1 + $0x58] sm:$0xff]  }
  0x8f   : > { %v2333_v10 = vrot.slane %v2331_v35, 6  ;;  %v2171_v32 = vrot.slane %v6749_v20, 5  ;;  %v5012_v34 = vrot.slane %v6863_v44, 9  ;;  %v2349_v12 = vshll.u32 %v6788_v51, 16 }
  0x90   : > { %v6881_v33 = vsel %vm6308_vm3, %v5010_v8, %v2167_v1  ;;  %v2175_v37 = vrot.slane %v6752_v11, 5  ;;  %v2299_v52 = vrot.slane %v2298_v39, 4  ;;  %v2307_v43 = vor.u32 %v2306_v7, %v2303_v58  ;;  %v5028_v7 = vld [vmem:[%s6270_s27 + $0x34] sm:$0x3] }
  0x91   : > { %5615 = vmatmul.mubr.msk.bf16.gmra.mrb[4].mxu0 %vm380_vm0, %v6118_v49  ;;  %v6871_v49 = vsel %vm6308_vm3, %v5009_v2, %v2163_v50  ;;  %v2317_v41 = vrot.slane %v2316_v47, 4  ;;  %v2325_v2 = vor.u32 %v2324_v28, %v2321_v16  ;;  %v2337_v20 = vshrl.u32 %v5026_v59, 16  ;;  %v5029_v16 = vld [vmem:[%s6270_s27 + $0x3c] sm:$0x3] }
  0x92   : > { %5620 = vmatprep.mubr.msk.bf16.mxu0 %vm380_vm0, %v4988_v63  ;;  %v2346_v63 = vshrl.u32 %v6788_v51, 16  ;;  %v2340_v50 = vshll.u32 %v5026_v59, 16  ;;  %v2334_v51 = vor.u32 %v2333_v10, %v2330_v46  ;;  %v2355_v35 = vshrl.u32 %v5027_v53, 16 }
  0x93   : > { %v2358_v55 = vshll.u32 %v5027_v53, 16  ;;  %v2364_v8 = vshrl.u32 %v6829_v13, 16  ;;  %v6894_v1 = vsel %vm6308_vm3, %v5011_v19, %v2171_v32  ;;  %v2351_v58 = vrot.slane %v2349_v12, 6  ;;  %v5062_v12 = vld [vmem:[%s6270_s27 + $0x18] sm:$0xf] }
  0x94   : > { %v2348_v39 = vrot.slane %v2346_v63, 5  ;;  %v6901_v10 = vsel %vm6308_vm3, %v5012_v34, %v2175_v37  ;;  %v6905_v47 = vsel %vm6393_vm6, %v2299_v52, %v2307_v43  ;;  %v2367_v28 = vshll.u32 %v6829_v13, 16 }
  0x95   : > { %v2382_v19 = vshrl.u32 %v6844_v14, 16  ;;  %v2339_v59 = vrot.slane %v2337_v20, 5  ;;  %v2342_v46 = vrot.slane %v2340_v50, 6  ;;  %v2385_v32 = vshll.u32 %v6844_v14, 16  ;;  %v5030_v14 = vld [vmem:[%s6270_s27 + $0x44] sm:$0x3] }
  0x96   : > { %v2335_v34 = vrot.slane %v2334_v51, 4  ;;  %v2357_v13 = vrot.slane %v2355_v35, 5  ;;  %v2360_v53 = vrot.slane %v2358_v55, 6  ;;  %v2366_v63 = vrot.slane %v2364_v8, 5 }
  0x97   : > { %v2373_v37 = vshrl.u32 %v5028_v7, 16  ;;  %v2403_v52 = vshll.u32 %v6849_v6, 16  ;;  %v2369_v43 = vrot.slane %v2367_v28, 6  ;;  %v2391_v20 = vshrl.u32 %v5029_v16, 16 }
  0x98   : > { %v2343_v51 = vor.u32 %v2342_v46, %v2339_v59  ;;  %v2387_v35 = vrot.slane %v2385_v32, 6  ;;  %v2394_v55 = vshll.u32 %v5029_v16, 16  ;;  %v2418_v11 = vshrl.u32 %v6863_v44, 16 }
  0x99   : > { %5621 = vmatmul.mubr.msk.bf16.vlgmr.msra.gmra.mrb[0].mxu0 %vm380_vm0, %v6813_v36  ;;  %v6915_v36 = vsel %vm6393_vm6, %v2317_v41, %v2325_v2  ;;  %v2376_v41 = vshll.u32 %v5028_v7, 16  ;;  %v2384_v2 = vrot.slane %v2382_v19, 5  ;;  %v2405_v28 = vrot.slane %v2403_v52, 6  ;;  %v5064_v19 = vld [vmem:[%s6270_s27 + $0x20] sm:$0xf] }
  0x9a   : > { %5629 = vmatpush3.bf16.msra.mxu0 %v6799_v60  ;;  %5624 = vmatprep.mubr.msk.bf16.mxu0 %vm380_vm0, %v6818_v25  ;;  %v2352_v60 = vor.u32 %v2351_v58, %v2348_v39  ;;  %v2400_v25 = vshrl.u32 %v6849_v6, 16  ;;  %v2361_v39 = vor.u32 %v2360_v53, %v2357_v13  ;;  %v5031_v58 = vld [vmem:[%s6270_s27 + $0x4c] sm:$0x3]  ;;  %v2421_v6 = vshll.u32 %v6863_v44, 16 }
  0x9b   : > { %5638 = vmatprep.subr.bf16.mxu0 %v6887_v9  ;;  %v2681_v57 = vshrl.u32 %v5062_v12, 16  ;;  %v2684_v42 = vshll.u32 %v5062_v12, 16  ;;  %v2375_v16 = vrot.slane %v2373_v37, 5  ;;  %v2378_v46 = vrot.slane %v2376_v41, 6  ;;  %v6938_v12 = vld [vmem:[%s6270_s27 + $0x1c] sm:$0x1] }
  0x9c   : > { %v2402_v7 = vrot.slane %v2400_v25, 5  ;;  %v2353_v59 = vrot.slane %v2352_v60, 4  ;;  %v2393_v32 = vrot.slane %v2391_v20, 5  ;;  %v7801_v13 = vcombine.low %v6822_v45, %v6826_v0  ;;  %v5066_v45 = vld [vmem:[%s6270_s27 + $0x28] sm:$0xf] }
  0x9d   : > { %v2370_v44 = vor.u32 %v2369_v43, %v2366_v63  ;;  %v2388_v53 = vor.u32 %v2387_v35, %v2384_v2  ;;  %v2396_v25 = vrot.slane %v2394_v55, 6  ;;  %v2409_v52 = vshrl.u32 %v5030_v14, 16  ;;  %v5068_v2 = vld [vmem:[%s6270_s27 + $0x30] sm:$0xf] }
  0x9e   : > { %v2412_v8 = vshll.u32 %v5030_v14, 16  ;;  %v2423_v60 = vrot.slane %v2421_v6, 6  ;;  %v2427_v37 = vshrl.u32 %v5031_v58, 16  ;;  %v2406_v41 = vor.u32 %v2405_v28, %v2402_v7  ;;  %v5070_v14 = vld [vmem:[%s6270_s27 + $0x38] sm:$0xf]  ;;  %v6955_v6 = vld [vmem:[%s7786_s1 + $0x60] sm:$0xff]  }
  0x9f   : > { %v2430_v20 = vshll.u32 %v5031_v58, 16  ;;  %v2683_v50 = vrot.slane %v2681_v57, 4  ;;  %v2686_v56 = vrot.slane %v2684_v42, 5  ;;  %v6943_v0 = vsel %vm6393_vm6, %v2335_v34, %v2343_v51  ;;  %v5072_v42 = vld [vmem:[%s6270_s27 + $0x40] sm:$0xf] }
  0xa0   : > { %v6947_v63 = vsel %vm6393_vm6, %v2353_v59, %v2361_v39  ;;  %v2695_v43 = vshrl.u32 %v5064_v19, 16  ;;  %v2371_v35 = vrot.slane %v2370_v44, 4  ;;  %v2379_v55 = vor.u32 %v2378_v46, %v2375_v16  ;;  %v6962_v7 = vld [vmem:[%s6270_s27 + $0x24] sm:$0x1] }
  0xa1   : > { %5625 = vmatmul.mubr.msk.bf16.gmra.mrb[4].mxu0 %vm380_vm0, %v6867_v29  ;;  %v2420_v29 = vrot.slane %v2418_v11, 5  ;;  %v2698_v11 = vshll.u32 %v5064_v19, 16  ;;  %v2389_v58 = vrot.slane %v2388_v53, 4  ;;  %v2397_v57 = vor.u32 %v2396_v25, %v2393_v32  ;;  %v6966_v19 = vld [vmem:[%s6270_s27 + $0x2c] sm:$0x1] }
  0xa2   : > { %5630 = vmatprep.mubr.msk.bf16.mxu0 %vm380_vm0, %v7801_v13  ;;  %v6957_v34 = vrot.slane %v2409_v52, 5  ;;  %v6959_v51 = vrot.slane %v2412_v8, 6  ;;  %v2690_v28 = vshll.u32 %v6938_v12, 16  ;;  %v2407_v59 = vrot.slane %v2406_v41, 4 }
  0xa3   : > { %v2424_v39 = vor.u32 %v2423_v60, %v2420_v29  ;;  %v6968_v16 = vrot.slane %v2427_v37, 5  ;;  %v2432_v46 = vrot.slane %v2430_v20, 6  ;;  %v2687_v32 = vor.u32 %v2686_v56, %v2683_v50  ;;  %v6983_v37 = vld [vmem:[%s6270_s27 + $0x34] sm:$0x1] }
  0xa4   : > { %v7802_v13 = vcombine.low %v6837_v27, %v6841_v3  ;;  %v2697_v8 = vrot.slane %v2695_v43, 4  ;;  %v2700_v44 = vrot.slane %v2698_v11, 5  ;;  %v2709_v53 = vshrl.u32 %v5066_v45, 16  ;;  %v6996_v43 = vld [vmem:[%s6270_s27 + $0x3c] sm:$0x1] }
  0xa5   : > { %v2712_v25 = vshll.u32 %v5066_v45, 16  ;;  %v7803_v52 = vcombine.low %v6871_v49, %v6881_v33  ;;  %v2723_v29 = vshrl.u32 %v5068_v2, 16  ;;  %v2726_v60 = vshll.u32 %v5068_v2, 16 }
  0xa6   : > { %v2737_v56 = vshrl.u32 %v5070_v14, 16  ;;  %v2740_v50 = vshll.u32 %v5070_v14, 16  ;;  %v2425_v27 = vrot.slane %v2424_v39, 4  ;;  %v6980_v3 = vrot.slane %v2690_v28, 5  ;;  %v5074_v39 = vld [vmem:[%s6270_s27 + $0x48] sm:$0xf] }
  0xa7   : > { %v2754_v41 = vshll.u32 %v5072_v42, 16  ;;  %v6987_v49 = vsel %vm6393_vm6, %v2371_v35, %v2379_v55  ;;  %v6991_v33 = vsel %vm6393_vm6, %v2389_v58, %v2397_v57  ;;  %v2704_v20 = vshll.u32 %v6962_v7, 16  ;;  %v7000_v35 = vld [vmem:[%s6270_s27 + $0x44] sm:$0x1]  ;;  %v5076_v58 = vld [vmem:[%s6270_s27 + $0x50] sm:$0xf] }
  0xa8   : > { %v2718_v45 = vshll.u32 %v6966_v19, 16  ;;  %v2688_v11 = vrot.slane %v2687_v32, 4  ;;  %v2701_v2 = vor.u32 %v2700_v44, %v2697_v8  ;;  %v2711_v14 = vrot.slane %v2709_v53, 4 }
  0xa9   : > { %5631 = vmatmul.mubr.msk.bf16.vlgmr.msra.gmra.mrb[0].mxu0 %vm380_vm0, %v7802_v13  ;;  %v2725_v28 = vrot.slane %v2723_v29, 4  ;;  %v2728_v13 = vrot.slane %v2726_v60, 5  ;;  %v2739_v55 = vrot.slane %v2737_v56, 4  ;;  %v5035_v57 = vcombine.low %v6943_v0, %v6947_v63 }
  0xaa   : > { %5639 = vmatpush3.bf16.msra.mxu0 %v6887_v9  ;;  %5634 = vmatprep.mubr.msk.bf16.mxu0 %vm380_vm0, %v7803_v52  ;;  %v2751_v9 = vshrl.u32 %v5072_v42, 16  ;;  %v2714_v42 = vrot.slane %v2712_v25, 5  ;;  %v2742_v52 = vrot.slane %v2740_v50, 5  ;;  %v5036_v17 = vcombine.low %v6987_v49, %v6991_v33 }
  0xab   : > { %5648 = vmatprep.subr.bf16.mxu0 %v6955_v6  ;;  %v2756_v8 = vrot.slane %v2754_v41, 5  ;;  %v2415_v44 = vor.u32 %v6959_v51, %v6957_v34  ;;  %v2433_v53 = vor.u32 %v2432_v46, %v6968_v16  ;;  %v2706_v25 = vrot.slane %v2704_v20, 5 }
  0xac   : > { %v2753_v32 = vrot.slane %v2751_v9, 4  ;;  %v2732_v29 = vshll.u32 %v6983_v37, 16  ;;  %v7804_v60 = vcombine.low %v6894_v1, %v6901_v10  ;;  %v2702_v0 = vrot.slane %v2701_v2, 4  ;;  %v7027_v10 = vld [vmem:[%s6270_s27 + $0x54] sm:$0x1]  ;;  %v7043_v2 = vld [vmem:[%s7786_s1 + $0x68] sm:$0xff]  }
  0xad   : > { %v2715_v63 = vor.u32 %v2714_v42, %v2711_v14  ;;  %v7018_v56 = vrot.slane %v2718_v45, 5  ;;  %v2746_v50 = vshll.u32 %v6996_v43, 16  ;;  %v7805_v34 = vcombine.low %v6905_v47, %v6915_v36 }
  0xae   : > { %v2729_v51 = vor.u32 %v2728_v13, %v2725_v28  ;;  %v2743_v16 = vor.u32 %v2742_v52, %v2739_v55  ;;  %v2765_v46 = vshrl.u32 %v5074_v39, 16  ;;  %v2768_v9 = vshll.u32 %v5074_v39, 16  ;;  %v7055_v39 = vld [vmem:[%s6270_s27 + $0x18] sm:$0xe] }
  0xaf   : > { %v2757_v41 = vor.u32 %v2756_v8, %v2753_v32  ;;  %v2760_v1 = vshll.u32 %v7000_v35, 16  ;;  %v2774_v49 = vshll.u32 %v7003_v62, 16  ;;  %v2779_v33 = vshrl.u32 %v5076_v58, 16  ;;  %v7070_v8 = vld [vmem:[%s6270_s27 + $0x20] sm:$0xe] }
  0xb0   : > { %v7032_v20 = vsel %vm6393_vm6, %v2407_v59, %v2415_v44  ;;  %v7036_v47 = vsel %vm6393_vm6, %v2425_v27, %v2433_v53  ;;  %v7038_v36 = vrot.slane %v2732_v29, 5  ;;  %v2782_v45 = vshll.u32 %v5076_v58, 16 }
  0xb1   : > { %5635 = vmatmul.mubr.msk.bf16.gmra.mrb[4].mxu0 %vm380_vm0, %v7804_v60  ;;  %v2693_v14 = vsel %vm6489_vm9, %v2688_v11, %v6980_v3  ;;  %v2707_v59 = vsel %vm6489_vm9, %v2702_v0, %v2706_v25  ;;  %v7050_v42 = vrot.slane %v2715_v63, 4  ;;  %v7052_v27 = vrot.slane %v2746_v50, 5  ;;  %v6203_v50 = vld [vmem:[%s6270_s27 + $0x4] sm:$0x1] }
  0xb2   : > { %5640 = vmatprep.mubr.msk.bf16.mxu0 %vm380_vm0, %v7805_v34  ;;  %v7057_v28 = vrot.slane %v2729_v51, 4  ;;  %v7059_v13 = vrot.slane %v2743_v16, 4  ;;  %v2767_v55 = vrot.slane %v2765_v46, 4  ;;  %v2770_v52 = vrot.slane %v2768_v9, 5  ;;  %v6122_v16 = vld [vmem:[%s6270_s27 + $0x18] ss:$8 sps:$4 sm:$0xff]  }
  0xb3   : > { %v7061_v58 = vrot.slane %v2757_v41, 4  ;;  %v7063_v32 = vrot.slane %v2760_v1, 5  ;;  %v7065_v3 = vrot.slane %v2774_v49, 5  ;;  %v7067_v11 = vrot.slane %v2779_v33, 4  ;;  %v6205_v41 = vld [vmem:[%s6270_s27 + $0x14] sm:$0x1] }
  0xb4   : > { %v2784_v44 = vrot.slane %v2782_v45, 5  ;;  %v2788_v53 = vshll.u32 %v7027_v10, 16  ;;  %v5037_v25 = vcombine.low %v7032_v20, %v7036_v47  ;;  %v7078_v29 = vcombine.low %v2693_v14, %v2707_v59  ;;  %v7098_v49 = vld [vmem:[%s6270_s27 + $0x28] sm:$0xe]  ;;  %v7104_v14 = vld [vmem:[%s6270_s27 + $0x38] sm:$0xe] }
  0xb5   : > { %v2771_v60 = vor.u32 %v2770_v52, %v2767_v55  ;;  %v5097_v0 = vrot.slane %v7055_v39, 9  ;;  %v2924_v63 = vrot.slane %v6938_v12, 5  ;;  %v257_v34 = vshll.u32 %v6203_v50, 16  ;;  %v5116_v55 = vld [vmem:[%s6270_s27 + $0x1c] sm:$0x3] }
  0xb6   : > { %v5098_v46 = vrot.slane %v7070_v8, 9  ;;  %v282_v9 = vor.u32 %v6318_v30, %v6303_v24  ;;  %v285_v1 = vshll.u32 %v6205_v41, 16  ;;  %v3069_v52 = vshrl.u32 %v7055_v39, 16 }
  0xb7   : > { %v259_v33 = vrot.slane %v257_v34, 5  ;;  %v2928_v41 = vrot.slane %v6962_v7, 5 }
  0xb8   : > { %v283_v45 = vrot.slane %v282_v9, 4  ;;  %v287_v24 = vrot.slane %v285_v1, 5  ;;  %v3071_v9 = vrot.slane %v3069_v52, 5  ;;  %v5099_v1 = vrot.slane %v7098_v49, 9 }
  0xb9   : > { %5641 = vmatmul.mubr.msk.bf16.vlgmr.msra.gmra.mrb[0].mxu0 %vm380_vm0, %v5035_v57  ;;  %v254_v57 = vor.u32 %v6297_v21, %v6292_v18  ;;  %v296_v18 = vor.u32 %v6457_v61, %v6320_v31  ;;  %v2785_v21 = vor.u32 %v2784_v44, %v7067_v11  ;;  %v6206_v61 = vld [vmem:[%s6270_s27 + $0x1c] sm:$0x1]  ;;  %v3072_v11 = vshll.u32 %v7055_v39, 16 }
  0xba   : > { %5649 = vmatpush3.bf16.msra.mxu0 %v6955_v6  ;;  %5644 = vmatprep.mubr.msk.bf16.mxu0 %vm380_vm0, %v5036_v17  ;;  %v268_v6 = vor.u32 %v6301_v23, %v6299_v22  ;;  %v6204_v17 = vld [vmem:[%s6270_s27 + $0xc] sm:$0x1]  ;;  %v7101_v22 = vld [vmem:[%s6270_s27 + $0x30] sm:$0xe]  ;;  %v299_v59 = vshll.u32 %v6206_v61, 16  ;;  %v7112_v44 = vrot.slane %v2771_v60, 4  ;;  %v288_v34 = vsel %vm6489_vm9, %v283_v45, %v287_v24 }
  0xbb   : > { %5658 = vmatprep.subr.bf16.mxu0 %v7043_v2  ;;  %v271_v51 = vshll.u32 %v6204_v17, 16  ;;  %v255_v23 = vrot.slane %v254_v57, 4  ;;  %v297_v30 = vrot.slane %v296_v18, 4  ;;  %v7114_v57 = vrot.slane %v2788_v53, 5  ;;  %v7125_v17 = vld [vmem:[%s6270_s27 + $0x48] sm:$0xe] }
  0xbc   : > { %v269_v20 = vrot.slane %v268_v6, 4  ;;  %v7122_v6 = vld [vmem:[%s6270_s27 + $0x40] sm:$0xe]  ;;  %v301_v60 = vrot.slane %v299_v59, 5  ;;  %v3074_v53 = vrot.slane %v3072_v11, 6  ;;  %v2932_v18 = vrot.slane %v6966_v19, 5 }
  0xbd   : > { %v273_v47 = vrot.slane %v271_v51, 5  ;;  %v260_v31 = vsel %vm6489_vm9, %v255_v23, %v259_v33  ;;  %v5117_v23 = vld [vmem:[%s6270_s27 + $0x24] sm:$0x3]  ;;  %v6132_v33 = vld [vmem:[%s7788_s3 + $0x8] sm:$0xff]   ;;  %v7145_v24 = vld [vmem:[%s6270_s27 + $0x50] sm:$0xe]  ;;  %v2735_v59 = vsel %vm6489_vm9, %v7057_v28, %v7038_v36 }
  0xbe   : > { %v6125_v61 = vld [vmem:[%s6270_s27 + $0x38] ss:$8 sps:$4 sm:$0xff]   ;;  %v3075_v11 = vor.u32 %v3074_v53, %v3071_v9  ;;  %v6134_v9 = vld [vmem:[%s7788_s3 + $0x10] sm:$0xff]   ;;  %v2763_v53 = vsel %vm6489_vm9, %v7061_v58, %v7063_v32  ;;  %v3099_v36 = vshll.u32 %v5117_v23, 16  ;;  %v6207_v28 = vld [vmem:[%s6270_s27 + $0x24] sm:$0x1] }
  0xbf   : > { %v274_v50 = vsel %vm6489_vm9, %v269_v20, %v273_v47  ;;  %v6124_v20 = vld [vmem:[%s6270_s27 + $0x28] ss:$8 sps:$4 sm:$0xff]   ;;  %v2721_v47 = vsel %vm6489_vm9, %v7050_v42, %v7018_v56  ;;  %v3078_v42 = vshrl.u32 %v5116_v55, 16  ;;  %v7814_v19 = vrot.slane %v7000_v35, 5 }
  0xc0   : > { %v4811_v51 = vcombine.low %v260_v31, %v274_v50  ;;  %v302_v31 = vsel %vm6489_vm9, %v297_v30, %v301_v60  ;;  %v3081_v50 = vshll.u32 %v5116_v55, 16  ;;  %v3090_v30 = vshll.u32 %v7070_v8, 16 }
  0xc1   : > { %5645 = vmatmul.mubr.msk.bf16.gmra.mrb[4].mxu0 %vm380_vm0, %v5037_v25  ;;  %v4812_v56 = vcombine.low %v288_v34, %v302_v31  ;;  %v2749_v55 = vsel %vm6489_vm9, %v7059_v13, %v7052_v27  ;;  %v3096_v31 = vshrl.u32 %v5117_v23, 16  ;;  %v7183_v52 = vrot.slane %v3078_v42, 5  ;;  %v5118_v27 = vld [vmem:[%s6270_s27 + $0x2c] sm:$0x3] }
  0xc2   : > { %5650 = vmatprep.mubr.msk.bf16.mxu0 %vm380_vm0, %v6122_v16  ;;  %v7141_v16 = vrot.slane %v2785_v21, 4  ;;  %5530 = vmatprep.mubr.msk.bf16.mxu1 %vm380_vm0, %v4811_v51  ;;  %v7159_v21 = vld [vmem:[%s7786_s1 + $0x70] sm:$0xff]   ;;  %v3087_v51 = vshrl.u32 %v7070_v8, 16  ;;  %v7187_v13 = vrot.slane %v3075_v11, 4  ;;  %v7189_v58 = vrot.slane %v3081_v50, 6 }
  0xc3   : > { %5531 = vmatmul.mubr.msk.bf16.vlgmr.msra.gmra.mrb[0].mxu1 %vm380_vm0, %v4812_v56  ;;  %v3092_v32 = vrot.slane %v3090_v30, 6  ;;  %v7193_v23 = vcombine.low %v2721_v47, %v2735_v59  ;;  %v7195_v34 = vcombine.low %v2749_v55, %v2763_v53  ;;  %v3105_v42 = vshrl.u32 %v7098_v49, 16  ;;  %v6208_v53 = vld [vmem:[%s6270_s27 + $0x2c] sm:$0x1]  ;;  %v7806_v8 = vld [vmem:[#allocation3_spill] sm:$0xff] }
  0xc4   : > { %5713 = vmatpush3.bf16.msra.mxu1 %v6759_v15  ;;  %v3089_v15 = vrot.slane %v3087_v51, 5  ;;  %v313_v56 = vshll.u32 %v6207_v28, 16  ;;  %v7201_v11 = vrot.slane %v3096_v31, 5  ;;  %v7203_v50 = vrot.slane %v3099_v36, 6  ;;  %v5119_v51 = vld [vmem:[%s6270_s27 + $0x34] sm:$0x3] }
  0xc5   : > { %5714 = vmatprep.subr.bf16.mxu1 %v6132_v33  ;;  %v3123_v47 = vshrl.u32 %v7101_v22, 16  ;;  %v310_v59 = vor.u32 %v6506_v5, %v6502_v4  ;;  %v324_v28 = vor.u32 %v6685_v38, %v6526_v40  ;;  %v7219_v36 = vsel %vm6308_vm3, %v5097_v0, %v2924_v63 }
  0xc6   : > { %v315_v30 = vrot.slane %v313_v56, 5  ;;  %v3093_v55 = vor.u32 %v3092_v32, %v3089_v15  ;;  %v327_v31 = vshll.u32 %v6208_v53, 16  ;;  %v3107_v60 = vrot.slane %v3105_v42, 5 }
  0xc7   : > { %v3117_v25 = vshll.u32 %v5118_v27, 16  ;;  %v311_v4 = vrot.slane %v310_v59, 4  ;;  %v325_v5 = vrot.slane %v324_v28, 4  ;;  %v3141_v40 = vshrl.u32 %v7104_v14, 16  ;;  %v6209_v28 = vld [vmem:[%s6270_s27 + $0x34] sm:$0x1] }
  0xc8   : > { %5715 = vmatpush3.bf16.msra.mxu1 %v6132_v33  ;;  %v3114_v33 = vshrl.u32 %v5118_v27, 16  ;;  %v329_v45 = vrot.slane %v327_v31, 5  ;;  %v3144_v38 = vshll.u32 %v7104_v14, 16  ;;  %v3125_v12 = vrot.slane %v3123_v47, 5  ;;  %v7808_v31 = vld [vmem:[#allocation5_spill] sm:$0xff] }
  0xc9   : > { %5651 = vmatmul.mubr.msk.bf16.vlgmr.msra.gmra.mrb[0].mxu0 %vm380_vm0, %v6124_v20  ;;  %v6126_v20 = vld [vmem:[%s6270_s27 + $0x48] ss:$8 sps:$4 sm:$0xff]   ;;  %5716 = vmatprep.subr.bf16.mxu1 %v6134_v9  ;;  %v3132_v0 = vshrl.u32 %v5119_v51, 16  ;;  %v316_v63 = vsel %vm6489_vm9, %v311_v4, %v315_v30  ;;  %v2777_v27 = vsel %vm6489_vm9, %v7112_v44, %v7065_v3  ;;  %v3159_v32 = vshrl.u32 %v7122_v6, 16 }
  0xca   : > { %5659 = vmatpush3.bf16.msra.mxu0 %v7043_v2  ;;  %5654 = vmatprep.mubr.msk.bf16.mxu0 %vm380_vm0, %v6125_v61  ;;  %v3108_v2 = vshll.u32 %v7098_v49, 16  ;;  %v3126_v61 = vshll.u32 %v7101_v22, 16  ;;  %v330_v15 = vsel %vm6489_vm9, %v325_v5, %v329_v45  ;;  %v7243_v42 = vsel %vm6308_vm3, %v5098_v46, %v2928_v41  ;;  %v7807_v46 = vld [vmem:[#allocation4_spill] sm:$0xff] }
  0xcb   : > { %5668 = vmatprep.subr.bf16.mxu0 %v7159_v21  ;;  %v7245_v3 = vrot.slane %v3093_v55, 4  ;;  %v3135_v44 = vshll.u32 %v5119_v51, 16  ;;  %v4813_v45 = vcombine.low %v316_v63, %v330_v15  ;;  %v7250_v47 = vrot.slane %v3117_v25, 6  ;;  %v7809_v25 = vld [vmem:[#allocation6_spill] sm:$0xff] }
  0xcc   : > { %v3110_v56 = vrot.slane %v3108_v2, 6  ;;  %5717 = vmatpush3.bf16.msra.mxu1 %v6134_v9  ;;  %v3128_v39 = vrot.slane %v3126_v61, 6  ;;  %v3162_v9 = vshll.u32 %v7122_v6, 16  ;;  %v7248_v2 = vrot.slane %v3114_v33, 5  ;;  %v5121_v61 = vld [vmem:[%s6270_s27 + $0x44] sm:$0x3] }
  0xcd   : > { %v3146_v59 = vrot.slane %v3144_v38, 6  ;;  %v7253_v30 = vrot.slane %v3132_v0, 5  ;;  %5534 = vmatprep.mubr.msk.bf16.mxu1 %vm380_vm0, %v4813_v45  ;;  %v338_v41 = vor.u32 %v7807_v46, %v7806_v8  ;;  %v341_v51 = vshll.u32 %v6209_v28, 16  ;;  %v6128_v0 = vld [vmem:[%s7786_s1 + $0x78] sm:$0xff]  }
  0xce   : > { %v3111_v7 = vor.u32 %v3110_v56, %v3107_v60  ;;  %v3129_v55 = vor.u32 %v3128_v39, %v3125_v12  ;;  %v3161_v53 = vrot.slane %v3159_v32, 5  ;;  %v3164_v33 = vrot.slane %v3162_v9, 6  ;;  %v6210_v56 = vld [vmem:[%s6270_s27 + $0x3c] sm:$0x1] }
  0xcf   : > { %v352_v4 = vor.u32 %v7809_v25, %v7808_v31  ;;  %v7261_v5 = vrot.slane %v3135_v44, 6  ;;  %v343_v60 = vrot.slane %v341_v51, 5  ;;  %v355_v38 = vshll.u32 %v6210_v56, 16  ;;  %v7270_v44 = vld [vmem:[%s6270_s27 + $0x4c] sm:$0x3] }
  0xd0   : > { %v3168_v39 = vshrl.u32 %v5121_v61, 16  ;;  %v3171_v32 = vshll.u32 %v5121_v61, 16  ;;  %v3112_v46 = vrot.slane %v3111_v7, 4  ;;  %v3165_v28 = vor.u32 %v3164_v33, %v3161_v53 }
  0xd1   : > { %5655 = vmatmul.mubr.msk.bf16.gmra.mrb[4].mxu0 %vm380_vm0, %v6126_v20  ;;  %v5120_v20 = vld [vmem:[%s6270_s27 + $0x3c] sm:$0x3]  ;;  %v353_v12 = vrot.slane %v352_v4, 4  ;;  %v357_v8 = vrot.slane %v355_v38, 5  ;;  %v5107_v25 = vcombine.low %v7219_v36, %v7243_v42  ;;  %v3186_v54 = vshrl.u32 %v7270_v44, 16 }
  0xd2   : > { %5660 = vmatprep.mubr.msk.bf16.mxu0 %vm380_vm0, %v7078_v29  ;;  %v3143_v29 = vrot.slane %v3141_v40, 5  ;;  %v339_v40 = vrot.slane %v338_v41, 4  ;;  %v3150_v15 = vshrl.u32 %v5120_v20, 16  ;;  %v3153_v45 = vshll.u32 %v5120_v20, 16 }
  0xd3   : > { %v3130_v41 = vrot.slane %v3129_v55, 4  ;;  %v2791_v20 = vsel %vm6489_vm9, %v7141_v16, %v7114_v57  ;;  %v358_v61 = vsel %vm6489_vm9, %v353_v12, %v357_v8  ;;  %v3170_v53 = vrot.slane %v3168_v39, 5 }
  0xd4   : > { %v3147_v63 = vor.u32 %v3146_v59, %v3143_v29  ;;  %v344_v9 = vsel %vm6489_vm9, %v339_v40, %v343_v60  ;;  %v3177_v29 = vshrl.u32 %v7125_v17, 16  ;;  %v3195_v59 = vshrl.u32 %v7145_v24, 16 }
  0xd5   : > { %v3152_v51 = vrot.slane %v3150_v15, 5  ;;  %v3155_v55 = vrot.slane %v3153_v45, 6  ;;  %v3173_v33 = vrot.slane %v3171_v32, 6  ;;  %v5083_v31 = vcombine.low %v2777_v27, %v2791_v20 }
  0xd6   : > { %v3148_v7 = vrot.slane %v3147_v63, 4  ;;  %v3166_v57 = vrot.slane %v3165_v28, 4  ;;  %v3179_v16 = vrot.slane %v3177_v29, 5  ;;  %v3189_v40 = vshll.u32 %v7270_v44, 16 }
  0xd7   : > { %v3197_v60 = vrot.slane %v3195_v59, 5  ;;  %v3198_v56 = vshll.u32 %v7145_v24, 16  ;;  %v2933_v36 = vsel %vm6308_vm3, %v5099_v1, %v2932_v18  ;;  %v7810_v27 = vrot.slane %v6983_v37, 5 }
  0xd8   : > { %v7811_v42 = vrot.slane %v7101_v22, 9  ;;  %v7812_v15 = vrot.slane %v6996_v43, 5  ;;  %v7813_v45 = vrot.slane %v7104_v14, 9  ;;  %v7815_v49 = vrot.slane %v7122_v6, 9  ;;  %v6131_v22 = vld [vmem:[%s7788_s3 + $0x40] sm:$0xff]  }
  0xd9   : > { %5661 = vmatmul.mubr.msk.bf16.vlgmr.msra.gmra.mrb[0].mxu0 %vm380_vm0, %v7193_v23  ;;  %v3180_v23 = vshll.u32 %v7125_v17, 16  ;;  %v3084_v43 = vor.u32 %v7189_v58, %v7183_v52  ;;  %v3102_v14 = vor.u32 %v7203_v50, %v7201_v11  ;;  %v7816_v35 = vrot.slane %v7003_v62, 5 }
  0xda   : > { %5669 = vmatpush3.bf16.msra.mxu0 %v7159_v21  ;;  %5664 = vmatprep.mubr.msk.bf16.mxu0 %vm380_vm0, %v7195_v34  ;;  %v4814_v21 = vcombine.low %v344_v9, %v358_v61  ;;  %v5123_v34 = vld [vmem:[%s6270_s27 + $0x54] sm:$0x3]  ;;  %v2937_v63 = vsel %vm6308_vm3, %v7811_v42, %v7810_v27  ;;  %v2941_v12 = vsel %vm6308_vm3, %v7813_v45, %v7812_v15  ;;  %v7817_v6 = vrot.slane %v7125_v17, 9 }
  0xdb   : > { %5678 = vmatprep.subr.bf16.mxu0 %v6128_v0  ;;  %v3182_v4 = vrot.slane %v3180_v23, 6  ;;  %v3204_v38 = vshrl.u32 %v5123_v34, 16  ;;  %v2945_v1 = vsel %vm6308_vm3, %v7815_v49, %v7814_v19  ;;  %v5108_v37 = vcombine.low %v2933_v36, %v2937_v63 }
  0xdc   : > { %5535 = vmatmul.mubr.msk.bf16.gmra.mrb[4].mxu1 %vm380_vm0, %v4814_v21  ;;  %v5109_v18 = vcombine.low %v2941_v12, %v2945_v1  ;;  %v2949_v39 = vsel %vm6308_vm3, %v7817_v6, %v7816_v35  ;;  %v7818_v32 = vrot.slane %v7027_v10, 5  ;;  %v7819_v9 = vrot.slane %v7145_v24, 9  ;;  %v5135_v1 = vld [vmem:[%s7787_s2] ss:$0 sm:$0xff] }
  0xdd   : > { %v3085_v58 = vsel %vm6393_vm6, %v7187_v13, %v3084_v43  ;;  %v3103_v62 = vsel %vm6393_vm6, %v7245_v3, %v3102_v14  ;;  %v3120_v17 = vor.u32 %v7250_v47, %v7248_v2  ;;  %v3138_v10 = vor.u32 %v7261_v5, %v7253_v30 }
  0xde   : > { %v2953_v52 = vsel %vm6308_vm3, %v7819_v9, %v7818_v32  ;;  %v3156_v24 = vor.u32 %v3155_v55, %v3152_v51  ;;  %v3174_v50 = vor.u32 %v3173_v33, %v3170_v53  ;;  %v5126_v26 = vcombine.low %v3085_v58, %v3103_v62  ;;  %v6135_v53 = vld [vmem:[%s7788_s3 + $0x50] sm:$0xff]  }
  0xdf   : > { %v5110_v11 = vcombine.low %v2949_v39, %v2953_v52  ;;  %v3207_v8 = vshll.u32 %v5123_v34, 16  ;;  %v3121_v13 = vsel %vm6393_vm6, %v3112_v46, %v3120_v17  ;;  %v3139_v44 = vsel %vm6393_vm6, %v3130_v41, %v3138_v10  ;;  %v6136_v34 = vld [vmem:[%s7788_s3 + $0x18] sm:$0xff]  }
  0xe0   : > { %v3157_v3 = vsel %vm6393_vm6, %v3148_v7, %v3156_v24  ;;  %v3175_v2 = vsel %vm6393_vm6, %v3166_v57, %v3174_v50  ;;  %v3188_v47 = vrot.slane %v3186_v54, 5  ;;  %v3191_v30 = vrot.slane %v3189_v40, 6  ;;  %v6133_v7 = vld [vmem:[%s7788_s3 + $0x48] sm:$0xff]   ;;  %5718 = vmatprep.subr.bf16.mxu1 %v6136_v34  ;;  %v6138_v54 = vld [vmem:[%s7788_s3 + $0x20] sm:$0xff]   ;;  %v6145_v40 = vld [vmem:[%s7788_s3 + $0x78] sm:$0xff]  }
  0xe1   : > { %5665 = vmatmul.mubr.msk.bf16.gmra.mrb[4].mxu0 %vm380_vm0, %v5083_v31  ;;  %v3183_v5 = vor.u32 %v3182_v4, %v3179_v16  ;;  %v3206_v29 = vrot.slane %v3204_v38, 5  ;;  %v3209_v20 = vrot.slane %v3207_v8, 6  ;;  %v5127_v46 = vcombine.low %v3121_v13, %v3139_v44  ;;  %5719 = vmatpush3.bf16.msra.mxu1 %v6136_v34  ;;  %v6139_v31 = vld [vmem:[%s7788_s3 + $0x60] sm:$0xff]   ;;  %v6143_v16 = vld [vmem:[%s7788_s3 + $0x70] sm:$0xff]   ;;  %v6140_v4 = vld [vmem:[%s7788_s3 + $0x28] sm:$0xff]  }
  0xe2   : > { %5670 = vmatprep.mubr.msk.bf16.mxu0 %vm380_vm0, %v5107_v25  ;;  %v5128_v61 = vcombine.low %v3157_v3, %v3175_v2  ;;  %v3192_v41 = vor.u32 %v3191_v30, %v3188_v47  ;;  %v6141_v25 = vld [vmem:[%s7788_s3 + $0x68] sm:$0xff]   ;;  %v6219_v57 = vmov 0.0   ;;  %5720 = vmatprep.subr.bf16.mxu1 %v6138_v54  ;;  %v7426_v38 = vld [vmem:[%s7788_s3 + $0x80] sm:$0xff]  }
  0xe3   : > { %v3184_v23 = vrot.slane %v3183_v5, 4  ;;  %v3210_v51 = vor.u32 %v3209_v20, %v3206_v29  ;;  %3347 = vst [vmem:[#allocation2 + $0x30] sm:$0xff] %v6219_v57  ;;  %3348 = vst [vmem:[#allocation2 + $0x38] sm:$0x3] %v6219_v57 }
  0xe4   : > { %3341 = vst [vmem:[#allocation2] sm:$0xff] %v6219_v57  ;;  %3342 = vst [vmem:[#allocation2 + $0x8] sm:$0x3] %v6219_v57 }
  0xe5   : > { %v3193_v55 = vsel %vm6393_vm6, %v3184_v23, %v3192_v41  ;;  %3343 = vst [vmem:[#allocation2 + $0x10] sm:$0xff] %v6219_v57  ;;  %3344 = vst [vmem:[#allocation2 + $0x18] sm:$0x3] %v6219_v57  ;;  %5721 = vmatpush3.bf16.msra.mxu1 %v6138_v54 }
  0xe6   : > { %3345 = vst [vmem:[#allocation2 + $0x20] sm:$0xff] %v6219_v57  ;;  %3346 = vst [vmem:[#allocation2 + $0x28] sm:$0x3] %v6219_v57  ;;  %5722 = vmatprep.subr.bf16.mxu1 %v6140_v4 }
  0xe7   : > { %3349 = vst [vmem:[#allocation2 + $0x40] sm:$0xff] %v6219_v57  ;;  %3350 = vst [vmem:[#allocation2 + $0x48] sm:$0x3] %v6219_v57 }
  0xe8   : > { %3351 = vst [vmem:[#allocation2 + $0x50] sm:$0xff] %v6219_v57  ;;  %3352 = vst [vmem:[#allocation2 + $0x58] sm:$0x3] %v6219_v57 }
  0xe9   : > { %5671 = vmatmul.mubr.msk.bf16.vlgmr.msra.gmra.mrb[0].mxu0 %vm380_vm0, %v5108_v37  ;;  %3353 = vst [vmem:[#allocation2 + $0x60] sm:$0xff] %v6219_v57  ;;  %3354 = vst [vmem:[#allocation2 + $0x68] sm:$0x3] %v6219_v57  ;;  %5723 = vmatpush3.bf16.msra.mxu1 %v6140_v4  ;;  %v6148_v4 = vld [vmem:[%s7788_s3 + $0x90] sm:$0xff]  }
  0xea   : > { %5679 = vmatpush3.bf16.msra.mxu0 %v6128_v0  ;;  %5674 = vmatprep.mubr.msk.bf16.mxu0 %vm380_vm0, %v5109_v18  ;;  %v3200_v0 = vrot.slane %v3198_v56, 6  ;;  %3355 = vst [vmem:[#allocation2 + $0x70] sm:$0xff] %v6219_v57  ;;  %3356 = vst [vmem:[#allocation2 + $0x78] sm:$0x3] %v6219_v57  ;;  %v6144_v56 = vld [vmem:[%s7788_s3 + $0x38] sm:$0xff]  }
  0xeb   : > { %5688 = vmatprep.subr.bf16.mxu0 %v6131_v22  ;;  %3357 = vst [vmem:[#allocation2 + $0x80] sm:$0xff] %v6219_v57  ;;  %3358 = vst [vmem:[#allocation2 + $0x88] sm:$0x3] %v6219_v57  ;;  %v3398_v58 = vld [vmem:[#allocation2 + $0x1] sm:$0xff] }
  0xec   : > { %v3201_v28 = vor.u32 %v3200_v0, %v3197_v60  ;;  %3359 = vst [vmem:[#allocation2 + $0x90] sm:$0xff] %v6219_v57  ;;  %3360 = vst [vmem:[#allocation2 + $0x98] sm:$0x3] %v6219_v57  ;;  %v6142_v60 = vld [vmem:[%s7788_s3 + $0x30] sm:$0xff]  }
  0xed   : > { %5724 = vmatprep.subr.bf16.mxu1 %v6142_v60 }
  0xee   : > { %v3202_v59 = vrot.slane %v3201_v28, 4  ;;  %5725 = vmatpush3.bf16.msra.mxu1 %v6142_v60 }
  0xef   : > { %5726 = vmatprep.subr.bf16.mxu1 %v6144_v56 }
  0xf0   : > { %v3211_v21 = vsel %vm6393_vm6, %v3202_v59, %v3210_v51 }
  0xf1   : > { %5675 = vmatmul.mubr.msk.bf16.gmra.mrb[4].mxu0 %vm380_vm0, %v5110_v11  ;;  %v5129_v33 = vcombine.low %v3193_v55, %v3211_v21 }
  0xf2   : > { %5680 = vmatprep.mubr.msk.bf16.mxu0 %vm380_vm0, %v5126_v26  ;;  %5727 = vmatpush3.bf16.msra.mxu1 %v6144_v56 }
  0xf3   : > { %5736 = vmatprep.subr.bf16.mxu1 %v7426_v38 }
  0xf9   : > { %5681 = vmatmul.mubr.msk.bf16.vlgmr.msra.gmra.mrb[0].mxu0 %vm380_vm0, %v5127_v46 }
  0xfa   : > { %5684 = vmatprep.mubr.msk.bf16.mxu0 %vm380_vm0, %v5128_v61  ;;  %5689 = vmatpush3.bf16.msra.mxu0 %v6131_v22 }
  0xfb   : > { %5690 = vmatprep.subr.bf16.mxu0 %v6133_v7 }
  0xfe   : > { %5691 = vmatpush3.bf16.msra.mxu0 %v6133_v7 }
  0xff   : > { %5692 = vmatprep.subr.bf16.mxu0 %v6135_v53 }
 0x101   : > { %5685 = vmatmul.mubr.msk.bf16.gmra.mrb[4].mxu0 %vm380_vm0, %v5129_v33 }
 0x102   : > { %5693 = vmatpush3.bf16.msra.mxu0 %v6135_v53 }
 0x103   : > { %5694 = vmatprep.subr.bf16.mxu0 %v6137_v48 }
 0x106   : > { %5695 = vmatpush3.bf16.msra.mxu0 %v6137_v48 }
 0x107   : > { %5696 = vmatprep.subr.bf16.mxu0 %v6139_v31 }
 0x10a   : > { %5697 = vmatpush3.bf16.msra.mxu0 %v6139_v31  ;;  %v6147_v31 = vld [vmem:[%s7788_s3 + $0x88] sm:$0xff]  }
 0x10b   : > { %5698 = vmatprep.subr.bf16.mxu0 %v6141_v25 }
 0x10e   : > { %5699 = vmatpush3.bf16.msra.mxu0 %v6141_v25 }
 0x10f   : > { %5700 = vmatprep.subr.bf16.mxu0 %v6143_v16 }
 0x112   : > { %5701 = vmatpush3.bf16.msra.mxu0 %v6143_v16 }
 0x113   : > { %5702 = vmatprep.subr.bf16.mxu0 %v6145_v40 }
 0x116   : > { %5703 = vmatpush3.bf16.msra.mxu0 %v6145_v40 }
 0x196   : > { %v5532_v36 = vpop.f32.mrb[0].mxu1 }
 0x197   : > { %v427_v27 = vpop.f32.mrb[1].mxu1 }
 0x198   : > { %v5533_v42 = vpop.f32.mrb[2].mxu1 }
 0x199   : > { %v430_v63 = vpop.f32.mrb[3].mxu1 }
 0x1af   : > { %v5536_v15 = vpop.f32.mrb[4].mxu1 }
 0x1b0   : > { %v443_v45 = vpop.f32.mrb[5].mxu1 }
 0x1b1   : > { %v5537_v12 = vpop.f32.mrb[6].mxu1 }
 0x1b2   : > { %v446_v19 = vpop.f32.mrb[7].mxu1 }
 0x1cc   : > { %v5682_v49 = vpop.f32.mrb[0].mxu0 }
 0x1cd   : > { %v5904_v37 = vadd.f32 %v5682_v49, %v5532_v36  ;;  %v3279_v22 = vpop.f32.mrb[1].mxu0  ;;  %v3653_v36 = vld [vmem:[#allocation2 + $0x2] sm:$0xff]  ;;  %v6150_v49 = vld [vmem:[%s7788_s3 + $0xa0] sm:$0xff]  }
 0x1ce   : > { %v5905_v18 = vadd.f32 %v3279_v22, %v427_v27  ;;  %v5683_v43 = vpop.f32.mrb[2].mxu0  ;;  %v6153_v22 = vld [vmem:[%s7788_s3 + $0xb8] sm:$0xff]  }
 0x1cf   : > { %v3327_v14 = vadd.f32 %v5904_v37, %v5135_v1  ;;  %v5906_v35 = vadd.f32 %v5683_v43, %v5533_v42  ;;  %v3282_v6 = vpop.f32.mrb[3].mxu0  ;;  %v6152_v37 = vld [vmem:[%s7788_s3 + $0xb0] sm:$0xff]  }
 0x1d0   : > { %v3325_v39 = vadd.f32 %v5905_v18, %v5135_v1  ;;  %v5907_v32 = vadd.f32 %v3282_v6, %v430_v63  ;;  %v6154_v18 = vld [vmem:[%s7788_s3 + $0xc0] sm:$0xff]   ;;  %v6156_v6 = vld [vmem:[%s7788_s3 + $0xd0] sm:$0xff]  }
 0x1d1   : > { %v7432_v9 = vmax.f32 %v3327_v14, 0.0  ;;  %v3328_v52 = vadd.f32 %v5906_v35, %v5135_v1  ;;  %v6155_v14 = vld [vmem:[%s7788_s3 + $0xc8] sm:$0xff]  }
 0x1d2   : > { %v7434_v62 = vmax.f32 %v3325_v39, 0.0  ;;  %v3326_v17 = vadd.f32 %v5907_v32, %v5135_v1 }
 0x1d3   : > { %3364 = vst [vmem:[#allocation2 + $0x31] sm:$0xff] %v7432_v9  ;;  %v7437_v10 = vmax.f32 %v3328_v52, 0.0  ;;  %v6157_v52 = vld [vmem:[%s7788_s3 + $0xd8] sm:$0xff]  }
 0x1d4   : > { %3362 = vst [vmem:[#allocation2 + $0x11] sm:$0xff] %v7434_v62  ;;  %v7440_v11 = vmax.f32 %v3326_v17, 0.0  ;;  %v5686_v24 = vpop.f32.mrb[4].mxu0  ;;  %v3406_v50 = vpack.c.bf16 %v7434_v62, %v3398_v58  ;;  %v6158_v17 = vld [vmem:[%s7788_s3 + $0xe0] sm:$0xff]  }
 0x1d5   : > { %3365 = vst [vmem:[#allocation2 + $0x41] sm:$0xff] %v7437_v10  ;;  %v5908_v26 = vadd.f32 %v5686_v24, %v5536_v15  ;;  %v3295_v0 = vpop.f32.mrb[5].mxu0  ;;  %v6149_v15 = vld [vmem:[%s7788_s3 + $0x98] sm:$0xff]   ;;  %v6159_v24 = vld [vmem:[%s7788_s3 + $0xe8] sm:$0xff]  }
 0x1d6   : > { %3363 = vst [vmem:[#allocation2 + $0x21] sm:$0xff] %v7440_v11  ;;  %v5909_v8 = vadd.f32 %v3295_v0, %v443_v45  ;;  %v5687_v13 = vpop.f32.mrb[6].mxu0  ;;  %5704 = vmatprep.mubr.bf16.mxu0 %v3406_v50  ;;  %v7447_v44 = vpack.c.bf16 %v7432_v9, %v7440_v11  ;;  %v6160_v50 = vld [vmem:[%s7788_s3 + $0xf0] sm:$0xff]   ;;  %v6162_v0 = vld [vmem:[%s7788_s3 + $0x100] sm:$0xff]  }
 0x1d7   : > { %v3331_v3 = vadd.f32 %v5908_v26, %v5135_v1  ;;  %v5910_v2 = vadd.f32 %v5687_v13, %v5537_v12  ;;  %v3298_v47 = vpop.f32.mrb[7].mxu0  ;;  %v6161_v26 = vld [vmem:[%s7788_s3 + $0xf8] sm:$0xff]   ;;  %v6163_v13 = vld [vmem:[%s7788_s3 + $0x108] sm:$0xff]  }
 0x1d8   : > { %v3329_v30 = vadd.f32 %v5909_v8, %v5135_v1  ;;  %v5911_v5 = vadd.f32 %v3298_v47, %v446_v19  ;;  %5705 = vmatmul.mubr.bf16.vlgmr.msra.gmra.mrb[8].mxu0 %v7447_v44 }
 0x1d9   : > { %v7450_v28 = vmax.f32 %v3331_v3, 0.0  ;;  %v3332_v29 = vadd.f32 %v5910_v2, %v5135_v1  ;;  %v6164_v2 = vld [vmem:[%s7788_s3 + $0x110] sm:$0xff]  }
 0x1da   : > { %v7452_v20 = vmax.f32 %v3329_v30, 0.0  ;;  %v3330_v46 = vadd.f32 %v5911_v5, %v5135_v1  ;;  %v7468_v7 = vld [vmem:[#allocation2 + $0x32] sm:$0xff]  ;;  %v6165_v5 = vld [vmem:[%s7788_s3 + $0x118] sm:$0xff]  }
 0x1db   : > { %3368 = vst [vmem:[#allocation2 + $0x71] sm:$0xff] %v7450_v28  ;;  %v7455_v61 = vmax.f32 %v3332_v29, 0.0  ;;  %v7457_v23 = vld [vmem:[#allocation2 + $0x10] sm:$0xff]  ;;  %v6151_v1 = vld [vmem:[%s7788_s3 + $0xa8] sm:$0xff]   ;;  %v3961_v29 = vpack.c.bf16 %v7440_v11, %v7434_v62 }
 0x1dc   : > { %3366 = vst [vmem:[#allocation2 + $0x51] sm:$0xff] %v7452_v20  ;;  %v7460_v41 = vmax.f32 %v3330_v46, 0.0  ;;  %v3378_v59 = vpack.c.bf16 %v7457_v23, %v6219_v57  ;;  %v7466_v51 = vpack.c.bf16 %v7452_v20, %v7437_v10  ;;  %v7470_v55 = vld [vmem:[#allocation2 + $0x42] sm:$0xff]  ;;  %v7475_v53 = vld [vmem:[#allocation2 + $0x30] sm:$0xff] }
 0x1dd   : > { %3369 = vst [vmem:[#allocation2 + $0x81] sm:$0xff] %v7455_v61  ;;  %v7473_v21 = vld [vmem:[#allocation2 + $0x20] sm:$0xff]  ;;  %v4112_v34 = vpack.c.bf16 %v7470_v55, %v7468_v7  ;;  %v7494_v54 = vld [vmem:[#allocation2 + $0x12] sm:$0xff] }
 0x1de   : > { %v7477_v33 = vld [vmem:[#allocation2 + $0x22] sm:$0xff]  ;;  %3367 = vst [vmem:[#allocation2 + $0x61] sm:$0xff] %v7460_v41  ;;  %5728 = vmatprep.mubr.bf16.mxu1 %v3378_v59  ;;  %v7484_v48 = vpack.c.bf16 %v7475_v53, %v7473_v21  ;;  %5708 = vmatprep.mubr.bf16.mxu0 %v7466_v51  ;;  %v7492_v25 = vpack.c.bf16 %v7450_v28, %v7460_v41  ;;  %v6166_v46 = vld [vmem:[%s7788_s3 + $0x120] sm:$0xff]  }
 0x1df   : > { %v4111_v16 = vpack.c.bf16 %v7477_v33, %v7494_v54  ;;  %v7504_v40 = vld [vmem:[#allocation2 + $0x40] sm:$0xff]  ;;  %v3661_v12 = vpack.c.bf16 %v7494_v54, %v3653_v36  ;;  %v7549_v43 = vpack.c.bf16 %v7468_v7, %v7477_v33  ;;  %v3811_v58 = vpack.c.bf16 %v7473_v21, %v7457_v23  ;;  %v6167_v23 = vld [vmem:[%s7788_s3 + $0x128] sm:$0xff]   ;;  %v6169_v21 = vld [vmem:[%s7788_s3 + $0x138] sm:$0xff]  }
 0x1e0   : > { %5729 = vmatmul.mubr.bf16.vlgmr.msra.gmra.mrb[8].mxu1 %v7484_v48  ;;  %5709 = vmatmul.mubr.bf16.gmra.mrb[12].mxu0 %v7492_v25  ;;  %v3812_v8 = vpack.c.bf16 %v7504_v40, %v7475_v53  ;;  %v6168_v59 = vld [vmem:[%s7788_s3 + $0x130] sm:$0xff]   ;;  %v6170_v53 = vld [vmem:[%s7788_s3 + $0x140] sm:$0xff]   ;;  %v3964_v36 = vpack.c.bf16 %v7455_v61, %v7450_v28  ;;  %v6177_v33 = vld [vmem:[%s7788_s3 + $0x178] sm:$0xff]  }
 0x1e1   : > { %5737 = vmatpush3.bf16.msra.mxu1 %v7426_v38  ;;  %v6178_v54 = vld [vmem:[%s7788_s3 + $0x180] sm:$0xff]   ;;  %v6181_v7 = vld [vmem:[%s7788_s3 + $0x198] sm:$0xff]  }
 0x1e2   : > { %5738 = vmatprep.subr.bf16.mxu1 %v6147_v31  ;;  %v7514_v42 = vld [vmem:[#allocation2 + $0x70] sm:$0xff] }
 0x1e3   : > { %v7506_v60 = vld [vmem:[#allocation2 + $0x50] sm:$0xff] }
 0x1e4   : > { %v7510_v56 = vpack.c.bf16 %v7506_v60, %v7504_v40  ;;  %v7526_v45 = vld [vmem:[#allocation2 + $0x52] sm:$0xff]  ;;  %v7600_v47 = vld [vmem:[#allocation2 + $0x80] sm:$0xff]  ;;  %v3963_v40 = vpack.c.bf16 %v7460_v41, %v7452_v20 }
 0x1e5   : > { %5739 = vmatpush3.bf16.msra.mxu1 %v6147_v31  ;;  %v7512_v27 = vld [vmem:[#allocation2 + $0x60] sm:$0xff]  ;;  %v7556_v35 = vpack.c.bf16 %v7526_v45, %v7470_v55  ;;  %v7563_v39 = vld [vmem:[#allocation2 + $0x72] sm:$0xff]  ;;  %v3814_v30 = vpack.c.bf16 %v7600_v47, %v7514_v42  ;;  %v3962_v31 = vpack.c.bf16 %v7437_v10, %v7432_v9 }
 0x1e6   : > { %v7516_v38 = vld [vmem:[#allocation2 + $0x62] sm:$0xff]  ;;  %5732 = vmatprep.mubr.bf16.mxu1 %v7510_v56  ;;  %5740 = vmatprep.subr.bf16.mxu1 %v6148_v4  ;;  %v7521_v63 = vpack.c.bf16 %v7514_v42, %v7512_v27  ;;  %v3813_v3 = vpack.c.bf16 %v7512_v27, %v7506_v60  ;;  %v6174_v42 = vld [vmem:[%s7788_s3 + $0x160] sm:$0xff]  }
 0x1e7   : > { %v4113_v19 = vpack.c.bf16 %v7516_v38, %v7526_v45  ;;  %v7567_v32 = vpack.c.bf16 %v7563_v39, %v7516_v38  ;;  %v6172_v60 = vld [vmem:[%s7788_s3 + $0x150] sm:$0xff]   ;;  %v6173_v27 = vld [vmem:[%s7788_s3 + $0x158] sm:$0xff]   ;;  %v6182_v55 = vld [vmem:[%s7788_s3 + $0x1a0] sm:$0xff]  }
 0x1e8   : > { %5733 = vmatmul.mubr.bf16.gmra.mrb[12].mxu1 %v7521_v63  ;;  %v6184_v38 = vld [vmem:[%s7788_s3 + $0x1b0] sm:$0xff]   ;;  %v6186_v45 = vld [vmem:[%s7788_s3 + $0x1c0] sm:$0xff]  }
 0x1e9   : > { %5741 = vmatpush3.bf16.msra.mxu1 %v6148_v4  ;;  %5752 = vmatprep.mubr.bf16.mxu1 %v3661_v12  ;;  %v6171_v4 = vld [vmem:[%s7788_s3 + $0x148] sm:$0xff]   ;;  %v6176_v12 = vld [vmem:[%s7788_s3 + $0x170] sm:$0xff]  }
 0x1ea   : > { %5742 = vmatprep.subr.bf16.mxu1 %v6149_v15 }
 0x1ed   : > { %5743 = vmatpush3.bf16.msra.mxu1 %v6149_v15  ;;  %v6175_v15 = vld [vmem:[%s7788_s3 + $0x168] sm:$0xff]  }
 0x1ee   : > { %5744 = vmatprep.subr.bf16.mxu1 %v6150_v49 }
 0x1f1   : > { %5745 = vmatpush3.bf16.msra.mxu1 %v6150_v49  ;;  %v6180_v49 = vld [vmem:[%s7788_s3 + $0x190] sm:$0xff]  }
 0x1f2   : > { %5746 = vmatprep.subr.bf16.mxu1 %v6151_v1 }
 0x1f5   : > { %5747 = vmatpush3.bf16.msra.mxu1 %v6151_v1  ;;  %v7669_v1 = vld [vmem:[#allocation2 + $0x82] sm:$0xff] }
 0x1f6   : > { %5748 = vmatprep.subr.bf16.mxu1 %v6152_v37 }
 0x1f9   : > { %5749 = vmatpush3.bf16.msra.mxu1 %v6152_v37  ;;  %v4114_v37 = vpack.c.bf16 %v7669_v1, %v7563_v39  ;;  %v6195_v39 = vld [vmem:[%s7788_s3 + $0x208] sm:$0xff]  }
 0x1fa   : > { %5750 = vmatprep.subr.bf16.mxu1 %v6153_v22 }
 0x1fd   : > { %5751 = vmatpush3.bf16.msra.mxu1 %v6153_v22  ;;  %v6188_v22 = vld [vmem:[%s7788_s3 + $0x1d0] sm:$0xff]  }
 0x1fe   : > { %5760 = vmatprep.subr.bf16.mxu1 %v6154_v18 }
 0x200   : > { %5753 = vmatmul.mubr.bf16.vlgmr.msra.gmra.mrb[8].mxu1 %v7549_v43 }
 0x201   : > { %5756 = vmatprep.mubr.bf16.mxu1 %v7556_v35  ;;  %5761 = vmatpush3.bf16.msra.mxu1 %v6154_v18  ;;  %v4265_v18 = vpack.c.bf16 %v6219_v57, %v7600_v47  ;;  %v6191_v57 = vld [vmem:[%s7788_s3 + $0x1e8] sm:$0xff]   ;;  %v6201_v47 = vld [vmem:[%s7788_s3 + $0x238] sm:$0xff]  }
 0x202   : > { %5762 = vmatprep.subr.bf16.mxu1 %v6155_v14 }
 0x205   : > { %5763 = vmatpush3.bf16.msra.mxu1 %v6155_v14  ;;  %v6189_v14 = vld [vmem:[%s7788_s3 + $0x1d8] sm:$0xff]  }
 0x206   : > { %5764 = vmatprep.subr.bf16.mxu1 %v6156_v6 }
 0x208   : > { %5757 = vmatmul.mubr.bf16.gmra.mrb[12].mxu1 %v7567_v32 }
 0x209   : > { %5765 = vmatpush3.bf16.msra.mxu1 %v6156_v6  ;;  %5776 = vmatprep.mubr.bf16.mxu1 %v3811_v58  ;;  %v6194_v6 = vld [vmem:[%s7788_s3 + $0x200] sm:$0xff]  }
 0x20a   : > { %5766 = vmatprep.subr.bf16.mxu1 %v6157_v52  ;;  %v4411_v58 = vld [vmem:[#allocation2 + $0x91] sm:$0xff] }
 0x20d   : > { %5767 = vmatpush3.bf16.msra.mxu1 %v6157_v52  ;;  %v6196_v52 = vld [vmem:[%s7788_s3 + $0x210] sm:$0xff]  }
 0x20e   : > { %5768 = vmatprep.subr.bf16.mxu1 %v6158_v17 }
 0x211   : > { %5769 = vmatpush3.bf16.msra.mxu1 %v6158_v17  ;;  %v4415_v17 = vpack.c.bf16 %v4411_v58, %v7455_v61 }
 0x212   : > { %5770 = vmatprep.subr.bf16.mxu1 %v6159_v24 }
 0x215   : > { %5771 = vmatpush3.bf16.msra.mxu1 %v6159_v24  ;;  %v6197_v24 = vld [vmem:[%s7788_s3 + $0x218] sm:$0xff]  }
 0x216   : > { %5772 = vmatprep.subr.bf16.mxu1 %v6160_v50 }
 0x219   : > { %5773 = vmatpush3.bf16.msra.mxu1 %v6160_v50 }
 0x21a   : > { %5774 = vmatprep.subr.bf16.mxu1 %v6161_v26 }
 0x21d   : > { %5775 = vmatpush3.bf16.msra.mxu1 %v6161_v26 }
 0x21e   : > { %5784 = vmatprep.subr.bf16.mxu1 %v6162_v0 }
 0x220   : > { %5777 = vmatmul.mubr.bf16.vlgmr.msra.gmra.mrb[8].mxu1 %v3812_v8 }
 0x221   : > { %5780 = vmatprep.mubr.bf16.mxu1 %v3813_v3  ;;  %5785 = vmatpush3.bf16.msra.mxu1 %v6162_v0  ;;  %v6199_v0 = vld [vmem:[%s7788_s3 + $0x228] sm:$0xff]  }
 0x222   : > { %5786 = vmatprep.subr.bf16.mxu1 %v6163_v13 }
 0x225   : > { %5787 = vmatpush3.bf16.msra.mxu1 %v6163_v13 }
 0x226   : > { %5788 = vmatprep.subr.bf16.mxu1 %v6164_v2 }
 0x228   : > { %5781 = vmatmul.mubr.bf16.gmra.mrb[12].mxu1 %v3814_v30 }
 0x229   : > { %5789 = vmatpush3.bf16.msra.mxu1 %v6164_v2  ;;  %5800 = vmatprep.mubr.bf16.mxu1 %v3961_v29 }
 0x22a   : > { %5790 = vmatprep.subr.bf16.mxu1 %v6165_v5 }
 0x22d   : > { %5791 = vmatpush3.bf16.msra.mxu1 %v6165_v5  ;;  %v4561_v5 = vld [vmem:[#allocation2 + $0x92] sm:$0xff] }
 0x22e   : > { %5792 = vmatprep.subr.bf16.mxu1 %v6166_v46  ;;  %v4565_v29 = vpack.c.bf16 %v4561_v5, %v7669_v1 }
 0x231   : > { %5793 = vmatpush3.bf16.msra.mxu1 %v6166_v46  ;;  %v4727_v46 = vlaneseq }
 0x232   : > { %5794 = vmatprep.subr.bf16.mxu1 %v6167_v23 }
 0x235   : > { %5795 = vmatpush3.bf16.msra.mxu1 %v6167_v23 }
 0x236   : > { %5796 = vmatprep.subr.bf16.mxu1 %v6168_v59 }
 0x239   : > { %5797 = vmatpush3.bf16.msra.mxu1 %v6168_v59  ;;  %v5336_v59 = vld [vmem:[%s7789_s4] ss:$0 sm:$0xff] }
 0x23a   : > { %5798 = vmatprep.subr.bf16.mxu1 %v6169_v21 }
 0x23d   : > { %5799 = vmatpush3.bf16.msra.mxu1 %v6169_v21  ;;  %v4728_v21 = vand.u32 127, %v4727_v46 }
 0x23e   : > { %5808 = vmatprep.subr.bf16.mxu1 %v6170_v53 }
 0x23f   : > { %vm4729_vm10 = vcmp.lt.s32.totalorder %v4728_v21, 64 }
 0x240   : > { %5801 = vmatmul.mubr.bf16.vlgmr.msra.gmra.mrb[8].mxu1 %v3962_v31 }
 0x241   : > { %5804 = vmatprep.mubr.bf16.mxu1 %v3963_v40  ;;  %5809 = vmatpush3.bf16.msra.mxu1 %v6170_v53 }
 0x242   : > { %5810 = vmatprep.subr.bf16.mxu1 %v6171_v4 }
 0x245   : > { %5811 = vmatpush3.bf16.msra.mxu1 %v6171_v4 }
 0x246   : > { %5812 = vmatprep.subr.bf16.mxu1 %v6172_v60 }
 0x248   : > { %5805 = vmatmul.mubr.bf16.gmra.mrb[12].mxu1 %v3964_v36 }
 0x249   : > { %5813 = vmatpush3.bf16.msra.mxu1 %v6172_v60  ;;  %5824 = vmatprep.mubr.bf16.mxu1 %v4111_v16  ;;  %v6179_v16 = vld [vmem:[%s7788_s3 + $0x188] sm:$0xff]  }
 0x24a   : > { %5814 = vmatprep.subr.bf16.mxu1 %v6173_v27 }
 0x24d   : > { %5815 = vmatpush3.bf16.msra.mxu1 %v6173_v27 }
 0x24e   : > { %5816 = vmatprep.subr.bf16.mxu1 %v6174_v42 }
 0x251   : > { %5817 = vmatpush3.bf16.msra.mxu1 %v6174_v42 }
 0x252   : > { %5818 = vmatprep.subr.bf16.mxu1 %v6175_v15 }
 0x255   : > { %5819 = vmatpush3.bf16.msra.mxu1 %v6175_v15 }
 0x256   : > { %5820 = vmatprep.subr.bf16.mxu1 %v6176_v12 }
 0x259   : > { %5821 = vmatpush3.bf16.msra.mxu1 %v6176_v12 }
 0x25a   : > { %5822 = vmatprep.subr.bf16.mxu1 %v6177_v33 }
 0x25d   : > { %5823 = vmatpush3.bf16.msra.mxu1 %v6177_v33 }
 0x25e   : > { %5832 = vmatprep.subr.bf16.mxu1 %v6178_v54 }
 0x260   : > { %5825 = vmatmul.mubr.bf16.vlgmr.msra.gmra.mrb[8].mxu1 %v4112_v34  ;;  %v6183_v34 = vld [vmem:[%s7788_s3 + $0x1a8] sm:$0xff]  }
 0x261   : > { %5828 = vmatprep.mubr.bf16.mxu1 %v4113_v19  ;;  %5833 = vmatpush3.bf16.msra.mxu1 %v6178_v54  ;;  %v6187_v19 = vld [vmem:[%s7788_s3 + $0x1c8] sm:$0xff]  }
 0x262   : > { %5834 = vmatprep.subr.bf16.mxu1 %v6179_v16 }
 0x265   : > { %5835 = vmatpush3.bf16.msra.mxu1 %v6179_v16 }
 0x266   : > { %5836 = vmatprep.subr.bf16.mxu1 %v6180_v49 }
 0x268   : > { %5829 = vmatmul.mubr.bf16.gmra.mrb[12].mxu1 %v4114_v37 }
 0x269   : > { %5837 = vmatpush3.bf16.msra.mxu1 %v6180_v49  ;;  %5848 = vmatprep.mubr.bf16.mxu1 %v7484_v48  ;;  %v6185_v48 = vld [vmem:[%s7788_s3 + $0x1b8] sm:$0xff]  }
 0x26a   : > { %5838 = vmatprep.subr.bf16.mxu1 %v6181_v7 }
 0x26d   : > { %5839 = vmatpush3.bf16.msra.mxu1 %v6181_v7 }
 0x26e   : > { %5840 = vmatprep.subr.bf16.mxu1 %v6182_v55 }
 0x271   : > { %5841 = vmatpush3.bf16.msra.mxu1 %v6182_v55 }
 0x272   : > { %5842 = vmatprep.subr.bf16.mxu1 %v6183_v34 }
 0x275   : > { %5843 = vmatpush3.bf16.msra.mxu1 %v6183_v34 }
 0x276   : > { %5844 = vmatprep.subr.bf16.mxu1 %v6184_v38 }
 0x279   : > { %5845 = vmatpush3.bf16.msra.mxu1 %v6184_v38 }
 0x27a   : > { %5846 = vmatprep.subr.bf16.mxu1 %v6185_v48 }
 0x27d   : > { %5847 = vmatpush3.bf16.msra.mxu1 %v6185_v48 }
 0x27e   : > { %5856 = vmatprep.subr.bf16.mxu1 %v6186_v45 }
 0x280   : > { %5849 = vmatmul.mubr.bf16.vlgmr.msra.gmra.mrb[8].mxu1 %v7510_v56  ;;  %v6190_v56 = vld [vmem:[%s7788_s3 + $0x1e0] sm:$0xff]  }
 0x281   : > { %5852 = vmatprep.mubr.bf16.mxu1 %v7521_v63  ;;  %5857 = vmatpush3.bf16.msra.mxu1 %v6186_v45  ;;  %v6192_v63 = vld [vmem:[%s7788_s3 + $0x1f0] sm:$0xff]  }
 0x282   : > { %5858 = vmatprep.subr.bf16.mxu1 %v6187_v19 }
 0x285   : > { %5859 = vmatpush3.bf16.msra.mxu1 %v6187_v19 }
 0x286   : > { %5860 = vmatprep.subr.bf16.mxu1 %v6188_v22 }
 0x288   : > { %5853 = vmatmul.mubr.bf16.gmra.mrb[12].mxu1 %v4265_v18 }
 0x289   : > { %5861 = vmatpush3.bf16.msra.mxu1 %v6188_v22  ;;  %5872 = vmatprep.mubr.bf16.mxu1 %v7447_v44  ;;  %v6193_v44 = vld [vmem:[%s7788_s3 + $0x1f8] sm:$0xff]  }
 0x28a   : > { %5862 = vmatprep.subr.bf16.mxu1 %v6189_v14 }
 0x28d   : > { %5863 = vmatpush3.bf16.msra.mxu1 %v6189_v14 }
 0x28e   : > { %5864 = vmatprep.subr.bf16.mxu1 %v6190_v56 }
 0x291   : > { %5865 = vmatpush3.bf16.msra.mxu1 %v6190_v56 }
 0x292   : > { %5866 = vmatprep.subr.bf16.mxu1 %v6191_v57 }
 0x295   : > { %5867 = vmatpush3.bf16.msra.mxu1 %v6191_v57 }
 0x296   : > { %5868 = vmatprep.subr.bf16.mxu1 %v6192_v63 }
 0x299   : > { %5869 = vmatpush3.bf16.msra.mxu1 %v6192_v63 }
 0x29a   : > { %5870 = vmatprep.subr.bf16.mxu1 %v6193_v44 }
 0x29d   : > { %5871 = vmatpush3.bf16.msra.mxu1 %v6193_v44 }
 0x29e   : > { %5880 = vmatprep.subr.bf16.mxu1 %v6194_v6 }
 0x2a0   : > { %5873 = vmatmul.mubr.bf16.vlgmr.msra.gmra.mrb[8].mxu1 %v7466_v51  ;;  %v6198_v51 = vld [vmem:[%s7788_s3 + $0x220] sm:$0xff]  }
 0x2a1   : > { %5876 = vmatprep.mubr.bf16.mxu1 %v7492_v25  ;;  %5881 = vmatpush3.bf16.msra.mxu1 %v6194_v6 }
 0x2a2   : > { %5882 = vmatprep.subr.bf16.mxu1 %v6195_v39 }
 0x2a5   : > { %5883 = vmatpush3.bf16.msra.mxu1 %v6195_v39 }
 0x2a6   : > { %5884 = vmatprep.subr.bf16.mxu1 %v6196_v52 }
 0x2a8   : > { %5877 = vmatmul.mubr.bf16.gmra.mrb[12].mxu1 %v4415_v17 }
 0x2a9   : > { %5885 = vmatpush3.bf16.msra.mxu1 %v6196_v52  ;;  %5896 = vmatprep.mubr.bf16.mxu1 %v7549_v43  ;;  %v6200_v43 = vld [vmem:[%s7788_s3 + $0x230] sm:$0xff]  }
 0x2aa   : > { %5886 = vmatprep.subr.bf16.mxu1 %v6197_v24 }
 0x2ab   : > { %v5706_v25 = vpop.f32.mrb[8].mxu0 }
 0x2ac   : > { %v3509_v50 = vpop.f32.mrb[9].mxu0 }
 0x2ad   : > { %5887 = vmatpush3.bf16.msra.mxu1 %v6197_v24  ;;  %v5707_v26 = vpop.f32.mrb[10].mxu0 }
 0x2ae   : > { %5888 = vmatprep.subr.bf16.mxu1 %v6198_v51  ;;  %v3512_v8 = vpop.f32.mrb[11].mxu0 }
 0x2b1   : > { %5889 = vmatpush3.bf16.msra.mxu1 %v6198_v51 }
 0x2b2   : > { %5890 = vmatprep.subr.bf16.mxu1 %v6199_v0 }
 0x2b3   : > { %v5710_v13 = vpop.f32.mrb[12].mxu0 }
 0x2b4   : > { %v3525_v3 = vpop.f32.mrb[13].mxu0 }
 0x2b5   : > { %5891 = vmatpush3.bf16.msra.mxu1 %v6199_v0  ;;  %v5711_v2 = vpop.f32.mrb[14].mxu0 }
 0x2b6   : > { %5892 = vmatprep.subr.bf16.mxu1 %v6200_v43  ;;  %v3528_v30 = vpop.f32.mrb[15].mxu0 }
 0x2b9   : > { %5893 = vmatpush3.bf16.msra.mxu1 %v6200_v43 }
 0x2ba   : > { %5894 = vmatprep.subr.bf16.mxu1 %v6201_v47 }
 0x2bd   : > { %5895 = vmatpush3.bf16.msra.mxu1 %v6201_v47 }
 0x2c0   : > { %5897 = vmatmul.mubr.bf16.vlgmr.msra.gmra.mrb[8].mxu1 %v7556_v35 }
 0x2c1   : > { %5900 = vmatprep.mubr.bf16.mxu1 %v7567_v32 }
 0x2c8   : > { %5901 = vmatmul.mubr.bf16.gmra.mrb[12].mxu1 %v4565_v29 }
 0x393   : > { %v5898_v23 = vpop.f32.mrb[8].mxu1 }
 0x394   : > { %v5912_v53 = vadd.f32 %v5898_v23, %v5706_v25  ;;  %v4665_v31 = vpop.f32.mrb[9].mxu1 }
 0x395   : > { %v5913_v4 = vadd.f32 %v4665_v31, %v3509_v50  ;;  %v5899_v40 = vpop.f32.mrb[10].mxu1 }
 0x396   : > { %v4713_v60 = vadd.f32 %v5912_v53, %v5336_v59  ;;  %v5914_v35 = vadd.f32 %v5899_v40, %v5707_v26  ;;  %v4668_v36 = vpop.f32.mrb[11].mxu1 }
 0x397   : > { %v4711_v32 = vadd.f32 %v5913_v4, %v5336_v59  ;;  %v5915_v27 = vadd.f32 %v4668_v36, %v3512_v8 }
 0x398   : > { %v4721_v42 = vmax.f32 %v4713_v60, 0.0  ;;  %v4714_v15 = vadd.f32 %v5914_v35, %v5336_v59 }
 0x399   : > { %v4719_v12 = vmax.f32 %v4711_v32, 0.0  ;;  %v4712_v33 = vadd.f32 %v5915_v27, %v5336_v59 }
 0x39a   : > { %v4732_v54 = vsel %vm4729_vm10, %v4721_v42, %v7432_v9  ;;  %v4722_v16 = vmax.f32 %v4714_v15, 0.0 }
 0x39b   : > { %4740 = vst [vmem:[%s7756_s23 + $0x10] sm:$0xff] %v4732_v54  ;;  %v4730_v49 = vsel %vm4729_vm10, %v4719_v12, %v7434_v62  ;;  %v4720_v1 = vmax.f32 %v4712_v33, 0.0  ;;  %v5902_v37 = vpop.f32.mrb[12].mxu1 }
 0x39c   : > { %4738 = vst [vmem:[%s7756_s23] sm:$0xff] %v4730_v49  ;;  %v4733_v7 = vsel %vm4729_vm10, %v4722_v16, %v7437_v10  ;;  %v5916_v55 = vadd.f32 %v5902_v37, %v5710_v13  ;;  %v4681_v34 = vpop.f32.mrb[13].mxu1 }
 0x39d   : > { %4741 = vst [vmem:[%s7756_s23 + $0x18] sm:$0xff] %v4733_v7  ;;  %v4731_v38 = vsel %vm4729_vm10, %v4720_v1, %v7440_v11  ;;  %v5917_v48 = vadd.f32 %v4681_v34, %v3525_v3  ;;  %v5903_v9 = vpop.f32.mrb[14].mxu1 }
 0x39e   : > { %4739 = vst [vmem:[%s7756_s23 + $0x8] sm:$0xff] %v4731_v38  ;;  %v4717_v45 = vadd.f32 %v5916_v55, %v5336_v59  ;;  %v5918_v62 = vadd.f32 %v5903_v9, %v5711_v2  ;;  %v4684_v19 = vpop.f32.mrb[15].mxu1 }
 0x39f   : > { %v4715_v22 = vadd.f32 %v5917_v48, %v5336_v59  ;;  %v5919_v18 = vadd.f32 %v4684_v19, %v3528_v30 }
 0x3a0   : > { %v4725_v14 = vmax.f32 %v4717_v45, 0.0  ;;  %v4718_v10 = vadd.f32 %v5918_v62, %v5336_v59 }
 0x3a1   : > { %v4723_v56 = vmax.f32 %v4715_v22, 0.0  ;;  %v4716_v57 = vadd.f32 %v5919_v18, %v5336_v59 }
 0x3a2   : > { %v4736_v63 = vsel %vm4729_vm10, %v4725_v14, %v7450_v28  ;;  %v4726_v44 = vmax.f32 %v4718_v10, 0.0 }
 0x3a3   : > { %4744 = vst [vmem:[%s7756_s23 + $0x30] sm:$0xff] %v4736_v63  ;;  %v4734_v11 = vsel %vm4729_vm10, %v4723_v56, %v7452_v20  ;;  %v4724_v6 = vmax.f32 %v4716_v57, 0.0 }
 0x3a4   : > { %4742 = vst [vmem:[%s7756_s23 + $0x20] sm:$0xff] %v4734_v11  ;;  %v4737_v39 = vsel %vm4729_vm10, %v4726_v44, %v7455_v61 }
 0x3a5   : > { %4745 = vst [vmem:[%s7756_s23 + $0x38] sm:$0xff] %v4737_v39  ;;  %v4735_v52 = vsel %vm4729_vm10, %v4724_v6, %v7460_v41 }
 0x3a6   : > { %4743 = vst [vmem:[%s7756_s23 + $0x28] sm:$0xff] %v4735_v52 }
 0x3a7 PF: > { %s15_s18 = sadd.s32 1, %s6217_s18  }
 0x3a8   : > { %p12_p4 = scmp.ge.s32.totalorder %s15_s18, 4  }
 0x3aa   :  { %14 = sbr.rel (!%p12_p4) target bundleno = 1 (0x1), region = 98 }

</bundles_post_ra>
